<compile_context>
chip_gen: v6e
topology: v6e:2x2x1
jax: 0.10.0
libtpu: 0.0.40
codegen_flags: <defaults>
</compile_context>

<pallas_src>
import functools
import math

import jax
import jax.numpy as jnp
from jax import lax
from jax.experimental import pallas as pl
from jax.experimental.pallas import tpu as pltpu


def _round_up(v, m):
    return (v + m - 1) // m * m


def _sigmoid_tanh(x):
    # sigmoid(x) == 0.5 * (tanh(0.5 * x) + 1): one EUP push instead of exp + reciprocal.
    return 0.5 * jnp.tanh(0.5 * x) + 0.5


def _gru_layer_kernel(gi_ref, whh_ref, bhn_ref, h0_ref, y_ref, hn_ref, h_scr,
                      *, t_chunk, t_real, t_pad, unroll):
    """One GRU layer.  grid = (batch blocks [parallel], time chunks [arbitrary]).

    gi_ref : (Tc, Bt, 3*Hp) bf16  precomputed input projection (+ folded r/z biases)
    whh_ref: (Hp, 3*Hp)     bf16  W_hh^T, gate blocks at Hp lane boundaries
    bhn_ref: (1, Hp)        f32   b_hn (must stay inside the r*(...) term)
    h0_ref : (Bt, Hp)       f32   initial hidden state (this batch block)
    y_ref  : (Tc, Bt, Hp)         per-step hidden output
    hn_ref : (Bt, Hp)             final hidden state (written only on last chunk)
    h_scr  : VMEM (Bt, Hp)  f32   hidden-state carry across time chunks
    """
    c = pl.program_id(1)                                    # time-chunk index
    Bt, Hp = h_scr.shape

    @pl.when(c == 0)
    def _():
        h_scr[...] = h0_ref[...].astype(jnp.float32)

    # Loop-invariant loads / broadcasts hoisted out of the unrolled time loop.
    whh_rz = whh_ref[:, :2 * Hp]                            # (Hp, 2Hp) bf16
    whh_n = whh_ref[:, 2 * Hp:]                             # (Hp,  Hp) bf16
    bhn = jnp.broadcast_to(bhn_ref[...], (Bt, Hp))          # (Bt, Hp)  f32

    def step(i, h_prev):
        gi_t = gi_ref[i].astype(jnp.float32)                # (Bt, 3Hp)
        h_bf = h_prev.astype(jnp.bfloat16)
        # Split recurrent matmul: r/z EUP work can overlap the n-gate matmul drain.
        gh_rz = jnp.dot(h_bf, whh_rz, preferred_element_type=jnp.float32)
        gh_n = jnp.dot(h_bf, whh_n, preferred_element_type=jnp.float32)
        r = _sigmoid_tanh(gi_t[:, :Hp] + gh_rz[:, :Hp])
        z = _sigmoid_tanh(gi_t[:, Hp:2 * Hp] + gh_rz[:, Hp:])
        n = jnp.tanh(gi_t[:, 2 * Hp:] + r * (gh_n + bhn))
        h_new = n + z * (h_prev - n)                        # == (1-z)*n + z*h
        if t_pad != t_real:                                 # static decision
            valid = (c * t_chunk + i) < t_real
            h_new = jnp.where(valid, h_new, h_prev)
        y_ref[i] = h_new.astype(y_ref.dtype)
        return h_new

    h_final = lax.fori_loop(0, t_chunk, step, h_scr[...], unroll=unroll)
    h_scr[...] = h_final

    @pl.when(c == pl.num_programs(1) - 1)
    def _():
        hn_ref[...] = h_final.astype(hn_ref.dtype)


def _prep_layer(p):
    """One-time per-layer weight preprocessing (hoisted out of the forward path)."""
    w_ih, w_hh, b_ih, b_hh = p["w_ih"], p["w_hh"], p["b_ih"], p["b_hh"]
    H = w_hh.shape[1]
    D = w_ih.shape[1]
    Hp = _round_up(H, 128)
    f32 = jnp.float32

    # W_ih^T with the 3 gate blocks placed at Hp lane boundaries (pre-GEMM weight).
    w_ih_t = jnp.pad(w_ih.T.reshape(D, 3, H).astype(f32),
                     ((0, 0), (0, 0), (0, Hp - H))).reshape(D, 3 * Hp)
    # b_ih plus (b_hr, b_hz, 0) fully folded into the pre-GEMM bias; b_hn stays in-kernel.
    gate_bias = b_ih.astype(f32) + jnp.concatenate(
        [b_hh[:2 * H].astype(f32), jnp.zeros((H,), f32)])
    gate_bias = jnp.pad(gate_bias.reshape(3, H), ((0, 0), (0, Hp - H))).reshape(3 * Hp)
    # Recurrent weight W_hh^T in bf16 (MXU-native), gate blocks at Hp boundaries.
    whh_t = jnp.pad(w_hh.T.reshape(H, 3, H).astype(f32),
                    ((0, Hp - H), (0, 0), (0, Hp - H))).reshape(Hp, 3 * Hp)
    whh_t = whh_t.astype(jnp.bfloat16)
    bhn_p = jnp.pad(b_hh[2 * H:].astype(f32), (0, Hp - H)).reshape(1, Hp)
    return dict(w_ih_t=w_ih_t, gate_bias=gate_bias, whh_t=whh_t, bhn=bhn_p, H=H, Hp=Hp)


def prepare_gru_params(params):
    """Precompute padded / transposed / bf16 weights once (reuse across forward calls)."""
    return [_prep_layer(p) for p in params]


def _invariant_spec(shape):
    """BlockSpec for a loop-invariant operand: single-buffered (2nd buffer is pure waste)."""
    idx = lambda b, c: (0,) * len(shape)
    try:
        return pl.BlockSpec(shape, idx, pipeline_mode=pl.Buffered(1))
    except (TypeError, AttributeError):   # older jax without pipeline_mode support
        return pl.BlockSpec(shape, idx)


def _gru_layer(prep, x, h0, *, t_chunk=32):
    """x: (T, B, D); h0: (B, H)."""
    T, B, D = x.shape
    H, Hp = prep["H"], prep["Hp"]
    f32 = jnp.float32
    out_dtype = x.dtype

    Bp = _round_up(B, 8)
    Tc = min(t_chunk, T)
    Tp = _round_up(T, Tc)
    # Two batch blocks when possible so v7x's second TensorCore gets its own half.
    nb = 2 if (Bp >= 16 and Bp % 16 == 0) else 1
    Bt = Bp // nb

    # ---- one big pre-GEMM over the whole sequence, produced directly in the padded,
    # ---- gate-lane-aligned layout, stored in bf16 (dominant HBM stream into the kernel).
    x_p = jnp.pad(x, ((0, Tp - T), (0, Bp - B), (0, 0)))
    gi = jnp.dot(x_p.reshape(Tp * Bp, D), prep["w_ih_t"].astype(x.dtype),
                 preferred_element_type=f32) + prep["gate_bias"]
    gi = gi.reshape(Tp, Bp, 3 * Hp).astype(jnp.bfloat16)

    h0_p = jnp.pad(h0.astype(f32), ((0, Bp - B), (0, Hp - H)))

    kernel = functools.partial(_gru_layer_kernel, t_chunk=Tc, t_real=T, t_pad=Tp,
                               unroll=min(8, Tc))

    # Explicit VMEM budget (scoped defaults: 16 MiB v5e / 32 MiB v6e,v7x) with headroom.
    itemsize = jnp.dtype(out_dtype).itemsize
    vmem_bytes = (2 * Tc * Bt * 3 * Hp * 2       # gi, double-buffered bf16
                  + 2 * Tc * Bt * Hp * itemsize  # y, double-buffered
                  + Hp * 3 * Hp * 2              # W_hh^T, single-buffered bf16
                  + 2 * Bt * Hp * 4              # h0
                  + 2 * Bt * Hp * itemsize       # hn
                  + Bt * Hp * 4                  # h scratch
                  + 2 * Hp * 4)                  # b_hn
    vmem_limit = min(max(int(vmem_bytes * 1.5) + (2 << 20), 32 << 20), 100 << 20)
    # TODO(synk): for H >= ~1536 on v7x (64 MiB physical VMEM), additionally tile the 3H
    # axis of W_hh inside the kernel (accumulate gh per gate block).

    y_p, hn_p = pl.pallas_call(
        kernel,
        out_shape=(
            jax.ShapeDtypeStruct((Tp, Bp, Hp), out_dtype),
            jax.ShapeDtypeStruct((Bp, Hp), out_dtype),
        ),
        grid_spec=pltpu.PrefetchScalarGridSpec(
            num_scalar_prefetch=0,
            grid=(nb, Tp // Tc),
            in_specs=[
                pl.BlockSpec((Tc, Bt, 3 * Hp), lambda b, c: (c, b, 0)),  # gi chunk
                _invariant_spec((Hp, 3 * Hp)),                           # W_hh^T (bf16)
                _invariant_spec((1, Hp)),                                # b_hn
                pl.BlockSpec((Bt, Hp), lambda b, c: (b, 0)),             # h0
            ],
            out_specs=[
                pl.BlockSpec((Tc, Bt, Hp), lambda b, c: (c, b, 0)),      # y chunk
                pl.BlockSpec((Bt, Hp), lambda b, c: (b, 0)),             # h_n
            ],
            scratch_shapes=[pltpu.VMEM((Bt, Hp), jnp.float32)],
        ),
        compiler_params=pltpu.CompilerParams(
            dimension_semantics=("parallel", "arbitrary"),
            vmem_limit_bytes=vmem_limit),
    )(gi, prep["whh_t"], prep["bhn"], h0_p)

    return y_p[:T, :B, :H], hn_p[:B, :H]


def init_gru_params(key, num_inputs, num_hiddens, num_layers):
    """Deterministic PyTorch-style uniform(-1/sqrt(H), 1/sqrt(H)) init."""
    k = 1.0 / math.sqrt(num_hiddens)
    params = []
    for layer in range(num_layers):
        d_in = num_inputs if layer == 0 else num_hiddens
        key, k1, k2, k3, k4 = jax.random.split(key, 5)
        params.append(dict(
            w_ih=jax.random.uniform(k1, (3 * num_hiddens, d_in), jnp.float32, -k, k),
            w_hh=jax.random.uniform(k2, (3 * num_hiddens, num_hiddens), jnp.float32, -k, k),
            b_ih=jax.random.uniform(k3, (3 * num_hiddens,), jnp.float32, -k, k),
            b_hh=jax.random.uniform(k4, (3 * num_hiddens,), jnp.float32, -k, k),
        ))
    return params


def gru_forward(params, inputs, H=None, *, prepared=None, t_chunk=32):
    """Multilayer GRU forward matching nn.GRU(num_inputs, H, num_layers) -> (output, H_n).

    inputs: (T, B, num_inputs);  H: (num_layers, B, num_hiddens) or None.
    Pass `prepared=prepare_gru_params(params)` to hoist weight preprocessing out of the
    forward path (recommended for repeated calls).
    """
    num_layers = len(params)
    num_hiddens = params[0]["w_hh"].shape[1]
    T, B, _ = inputs.shape
    if prepared is None:
        prepared = prepare_gru_params(params)
    if H is None:
        H = jnp.zeros((num_layers, B, num_hiddens), inputs.dtype)

    # TODO(synk): inter-layer dropout (training mode) is not applied; dropout=0 default.
    x = inputs
    h_finals = []
    for layer in range(num_layers):
        x, hn = _gru_layer(prepared[layer], x, H[layer], t_chunk=t_chunk)
        h_finals.append(hn)
    return x, jnp.stack(h_finals, axis=0)


def _gru_reference(params, inputs, H):
    """Plain-JAX f32 reference for sanity checking."""
    x = inputs
    h_finals = []
    for layer, p in enumerate(params):
        h = H[layer]
        ys = []
        for t in range(x.shape[0]):
            gi = x[t] @ p["w_ih"].T + p["b_ih"]
            gh = h @ p["w_hh"].T + p["b_hh"]
            i_r, i_z, i_n = jnp.split(gi, 3, axis=-1)
            h_r, h_z, h_n = jnp.split(gh, 3, axis=-1)
            r = jax.nn.sigmoid(i_r + h_r)
            z = jax.nn.sigmoid(i_z + h_z)
            n = jnp.tanh(i_n + r * h_n)
            h = (1.0 - z) * n + z * h
            ys.append(h)
        x = jnp.stack(ys, axis=0)
        h_finals.append(h)
    return x, jnp.stack(h_finals, axis=0)


if __name__ == "__main__":
    seq_len, batch = 8, 2
    num_inputs, num_hiddens, num_layers = 4, 32, 2

    key = jax.random.PRNGKey(0)
    key, kx, kh, kp = jax.random.split(key, 4)
    x = jax.random.normal(kx, (seq_len, batch, num_inputs), jnp.float32)
    h0 = jax.random.normal(kh, (num_layers, batch, num_hiddens), jnp.float32)
    params = init_gru_params(kp, num_inputs, num_hiddens, num_layers)
    prepared = prepare_gru_params(params)   # hoisted weight preprocessing

    y, hn = gru_forward(params, x, h0, prepared=prepared)
    y = jax.block_until_ready(y)
    hn = jax.block_until_ready(hn)

    y_ref, hn_ref = _gru_reference(params, x, h0)
    assert y.shape == (seq_len, batch, num_hiddens)
    assert hn.shape == (num_layers, batch, num_hiddens)
    # bf16 MXU operands / bf16 gi storage => looser tolerance than pure-f32.
    assert jnp.allclose(y, y_ref, atol=3e-2, rtol=3e-2), \
        float(jnp.max(jnp.abs(y - y_ref)))
    assert jnp.allclose(hn, hn_ref, atol=3e-2, rtol=3e-2), \
        float(jnp.max(jnp.abs(hn - hn_ref)))

    print("KERNEL_OK")
</pallas_src>

<mosaic_0001>
module attributes {stable_mosaic.version = 11 : i64} {
  func.func @_gru_layer_kernel(%arg0: i32, %arg1: i32, %arg2: memref<8x8x384xbf16, #tpu.memory_space<vmem>>, %arg3: memref<128x384xbf16, #tpu.memory_space<vmem>>, %arg4: memref<1x128xf32, #tpu.memory_space<vmem>>, %arg5: memref<8x128xf32, #tpu.memory_space<vmem>>, %arg6: memref<8x8x128xf32, #tpu.memory_space<vmem>>, %arg7: memref<8x128xf32, #tpu.memory_space<vmem>>, %arg8: memref<8x128xf32, #tpu.memory_space<vmem>>) attributes {dimension_semantics = [#tpu.dimension_semantics<parallel>, #tpu.dimension_semantics<arbitrary>], iteration_bounds = array<i64: 1, 1>, scalar_prefetch = 0 : i64, scratch_operands = 1 : i64, tpu.core_type = #tpu.core_type<tc>, window_params = [{transform_indices = @transform_0, window_bounds = array<i64: 8, 8, 384>}, {pipeline_mode = #tpu.pipeline_mode<synchronous>, transform_indices = @transform_1, window_bounds = array<i64: 128, 384>}, {pipeline_mode = #tpu.pipeline_mode<synchronous>, transform_indices = @transform_2, window_bounds = array<i64: 1, 128>}, {transform_indices = @transform_3, window_bounds = array<i64: 8, 128>}, {transform_indices = @transform_4, window_bounds = array<i64: 8, 8, 128>}, {transform_indices = @transform_5, window_bounds = array<i64: 8, 128>}]} {
    %c0_i32 = arith.constant 0 : i32
    %0 = arith.cmpi eq, %arg1, %c0_i32 : i32
    %1 = arith.extui %0 : i1 to i32
    %c0_i32_0 = arith.constant 0 : i32
    %2 = arith.cmpi ne, %1, %c0_i32_0 : i32
    scf.if %2 {
      %c0_107 = arith.constant 0 : index
      %c0_108 = arith.constant 0 : index
      %325 = vector.load %arg5[%c0_107, %c0_108] : memref<8x128xf32, #tpu.memory_space<vmem>>, vector<8x128xf32>
      %c0_109 = arith.constant 0 : index
      %c0_110 = arith.constant 0 : index
      %326 = vector.load %arg8[%c0_109, %c0_110] : memref<8x128xf32, #tpu.memory_space<vmem>>, vector<8x128xf32>
      tpu.vector_store %arg8[%c0_109, %c0_110], %325 {strides = array<i32>} : memref<8x128xf32, #tpu.memory_space<vmem>>, vector<8x128xf32>,
    } else {
    }
    %c0 = arith.constant 0 : index
    %c0_1 = arith.constant 0 : index
    %3 = vector.load %arg3[%c0, %c0_1] : memref<128x384xbf16, #tpu.memory_space<vmem>>, vector<128x256xbf16>
    %c0_2 = arith.constant 0 : index
    %c256 = arith.constant 256 : index
    %4 = vector.load %arg3[%c0_2, %c256] : memref<128x384xbf16, #tpu.memory_space<vmem>>, vector<128x128xbf16>
    %c0_3 = arith.constant 0 : index
    %c0_4 = arith.constant 0 : index
    %5 = vector.load %arg4[%c0_3, %c0_4] : memref<1x128xf32, #tpu.memory_space<vmem>>, vector<1x128xf32>
    %6 = vector.shape_cast %5 : vector<1x128xf32> to vector<1x128xf32>
    %7 = vector.broadcast %6 : vector<1x128xf32> to vector<8x128xf32>
    %c0_5 = arith.constant 0 : index
    %c0_6 = arith.constant 0 : index
    %8 = vector.load %arg8[%c0_5, %c0_6] : memref<8x128xf32, #tpu.memory_space<vmem>>, vector<8x128xf32>
    %c0_i32_7 = arith.constant 0 : i32
    %9 = arith.index_cast %c0_i32_7 : i32 to index
    %c0_8 = arith.constant 0 : index
    %c0_9 = arith.constant 0 : index
    %10 = vector.load %arg2[%9, %c0_8, %c0_9] : memref<8x8x384xbf16, #tpu.memory_space<vmem>>, vector<1x8x384xbf16>
    %11 = vector.shape_cast %10 : vector<1x8x384xbf16> to vector<8x384xbf16>
    %12 = arith.extf %11 : vector<8x384xbf16> to vector<8x384xf32>
    %13 = arith.truncf %8 : vector<8x128xf32> to vector<8x128xbf16>
    %cst = arith.constant dense<0.000000e+00> : vector<8x256xf32>
    %14 = tpu.matmul %13, %3, %cst {dimension_numbers = #tpu.dot_dimension_numbers<[1], [0], [0], [1], [0, 0, 1, 1], [], []>} : vector<8x128xbf16>, vector<128x256xbf16>, vector<8x256xf32> -> vector<8x256xf32>
    %cst_10 = arith.constant dense<0.000000e+00> : vector<8x128xf32>
    %15 = tpu.matmul %13, %4, %cst_10 {dimension_numbers = #tpu.dot_dimension_numbers<[1], [0], [0], [1], [0, 0, 1, 1], [], []>} : vector<8x128xbf16>, vector<128x128xbf16>, vector<8x128xf32> -> vector<8x128xf32>
    %16 = vector.extract_strided_slice %12 {offsets = [0, 0], sizes = [8, 128], strides = [1, 1]} : vector<8x384xf32> to vector<8x128xf32>
    %17 = vector.extract_strided_slice %14 {offsets = [0, 0], sizes = [8, 128], strides = [1, 1]} : vector<8x256xf32> to vector<8x128xf32>
    %18 = arith.addf %16, %17 : vector<8x128xf32>
    %cst_11 = arith.constant 5.000000e-01 : f32
    %19 = vector.broadcast %cst_11 : f32 to vector<8x128xf32>
    %20 = arith.mulf %19, %18 : vector<8x128xf32>
    %21 = math.tanh %20 : vector<8x128xf32>
    %cst_12 = arith.constant 5.000000e-01 : f32
    %22 = vector.broadcast %cst_12 : f32 to vector<8x128xf32>
    %23 = arith.mulf %22, %21 : vector<8x128xf32>
    %cst_13 = arith.constant 5.000000e-01 : f32
    %24 = vector.broadcast %cst_13 : f32 to vector<8x128xf32>
    %25 = arith.addf %23, %24 : vector<8x128xf32>
    %26 = vector.extract_strided_slice %12 {offsets = [0, 128], sizes = [8, 128], strides = [1, 1]} : vector<8x384xf32> to vector<8x128xf32>
    %27 = vector.extract_strided_slice %14 {offsets = [0, 128], sizes = [8, 128], strides = [1, 1]} : vector<8x256xf32> to vector<8x128xf32>
    %28 = arith.addf %26, %27 : vector<8x128xf32>
    %cst_14 = arith.constant 5.000000e-01 : f32
    %29 = vector.broadcast %cst_14 : f32 to vector<8x128xf32>
    %30 = arith.mulf %29, %28 : vector<8x128xf32>
    %31 = math.tanh %30 : vector<8x128xf32>
    %cst_15 = arith.constant 5.000000e-01 : f32
    %32 = vector.broadcast %cst_15 : f32 to vector<8x128xf32>
    %33 = arith.mulf %32, %31 : vector<8x128xf32>
    %cst_16 = arith.constant 5.000000e-01 : f32
    %34 = vector.broadcast %cst_16 : f32 to vector<8x128xf32>
    %35 = arith.addf %33, %34 : vector<8x128xf32>
    %36 = vector.extract_strided_slice %12 {offsets = [0, 256], sizes = [8, 128], strides = [1, 1]} : vector<8x384xf32> to vector<8x128xf32>
    %37 = arith.addf %15, %7 : vector<8x128xf32>
    %38 = arith.mulf %25, %37 : vector<8x128xf32>
    %39 = arith.addf %36, %38 : vector<8x128xf32>
    %40 = math.tanh %39 : vector<8x128xf32>
    %41 = arith.subf %8, %40 : vector<8x128xf32>
    %42 = arith.mulf %35, %41 : vector<8x128xf32>
    %43 = arith.addf %40, %42 : vector<8x128xf32>
    %44 = arith.index_cast %c0_i32_7 : i32 to index
    %c0_17 = arith.constant 0 : index
    %c0_18 = arith.constant 0 : index
    %45 = vector.load %arg6[%44, %c0_17, %c0_18] : memref<8x8x128xf32, #tpu.memory_space<vmem>>, vector<1x8x128xf32>
    %46 = vector.shape_cast %45 : vector<1x8x128xf32> to vector<8x128xf32>
    %47 = vector.shape_cast %43 : vector<8x128xf32> to vector<1x8x128xf32>
    tpu.vector_store %arg6[%44, %c0_17, %c0_18], %47 {strides = array<i32>} : memref<8x8x128xf32, #tpu.memory_space<vmem>>, vector<1x8x128xf32>,
    %c1_i32 = arith.constant 1 : i32
    %48 = arith.index_cast %c1_i32 : i32 to index
    %c0_19 = arith.constant 0 : index
    %c0_20 = arith.constant 0 : index
    %49 = vector.load %arg2[%48, %c0_19, %c0_20] : memref<8x8x384xbf16, #tpu.memory_space<vmem>>, vector<1x8x384xbf16>
    %50 = vector.shape_cast %49 : vector<1x8x384xbf16> to vector<8x384xbf16>
    %51 = arith.extf %50 : vector<8x384xbf16> to vector<8x384xf32>
    %52 = arith.truncf %43 : vector<8x128xf32> to vector<8x128xbf16>
    %cst_21 = arith.constant dense<0.000000e+00> : vector<8x256xf32>
    %53 = tpu.matmul %52, %3, %cst_21 {dimension_numbers = #tpu.dot_dimension_numbers<[1], [0], [0], [1], [0, 0, 1, 1], [], []>} : vector<8x128xbf16>, vector<128x256xbf16>, vector<8x256xf32> -> vector<8x256xf32>
    %cst_22 = arith.constant dense<0.000000e+00> : vector<8x128xf32>
    %54 = tpu.matmul %52, %4, %cst_22 {dimension_numbers = #tpu.dot_dimension_numbers<[1], [0], [0], [1], [0, 0, 1, 1], [], []>} : vector<8x128xbf16>, vector<128x128xbf16>, vector<8x128xf32> -> vector<8x128xf32>
    %55 = vector.extract_strided_slice %51 {offsets = [0, 0], sizes = [8, 128], strides = [1, 1]} : vector<8x384xf32> to vector<8x128xf32>
    %56 = vector.extract_strided_slice %53 {offsets = [0, 0], sizes = [8, 128], strides = [1, 1]} : vector<8x256xf32> to vector<8x128xf32>
    %57 = arith.addf %55, %56 : vector<8x128xf32>
    %cst_23 = arith.constant 5.000000e-01 : f32
    %58 = vector.broadcast %cst_23 : f32 to vector<8x128xf32>
    %59 = arith.mulf %58, %57 : vector<8x128xf32>
    %60 = math.tanh %59 : vector<8x128xf32>
    %cst_24 = arith.constant 5.000000e-01 : f32
    %61 = vector.broadcast %cst_24 : f32 to vector<8x128xf32>
    %62 = arith.mulf %61, %60 : vector<8x128xf32>
    %cst_25 = arith.constant 5.000000e-01 : f32
    %63 = vector.broadcast %cst_25 : f32 to vector<8x128xf32>
    %64 = arith.addf %62, %63 : vector<8x128xf32>
    %65 = vector.extract_strided_slice %51 {offsets = [0, 128], sizes = [8, 128], strides = [1, 1]} : vector<8x384xf32> to vector<8x128xf32>
    %66 = vector.extract_strided_slice %53 {offsets = [0, 128], sizes = [8, 128], strides = [1, 1]} : vector<8x256xf32> to vector<8x128xf32>
    %67 = arith.addf %65, %66 : vector<8x128xf32>
    %cst_26 = arith.constant 5.000000e-01 : f32
    %68 = vector.broadcast %cst_26 : f32 to vector<8x128xf32>
    %69 = arith.mulf %68, %67 : vector<8x128xf32>
    %70 = math.tanh %69 : vector<8x128xf32>
    %cst_27 = arith.constant 5.000000e-01 : f32
    %71 = vector.broadcast %cst_27 : f32 to vector<8x128xf32>
    %72 = arith.mulf %71, %70 : vector<8x128xf32>
    %cst_28 = arith.constant 5.000000e-01 : f32
    %73 = vector.broadcast %cst_28 : f32 to vector<8x128xf32>
    %74 = arith.addf %72, %73 : vector<8x128xf32>
    %75 = vector.extract_strided_slice %51 {offsets = [0, 256], sizes = [8, 128], strides = [1, 1]} : vector<8x384xf32> to vector<8x128xf32>
    %76 = arith.addf %54, %7 : vector<8x128xf32>
    %77 = arith.mulf %64, %76 : vector<8x128xf32>
    %78 = arith.addf %75, %77 : vector<8x128xf32>
    %79 = math.tanh %78 : vector<8x128xf32>
    %80 = arith.subf %43, %79 : vector<8x128xf32>
    %81 = arith.mulf %74, %80 : vector<8x128xf32>
    %82 = arith.addf %79, %81 : vector<8x128xf32>
    %83 = arith.index_cast %c1_i32 : i32 to index
    %c0_29 = arith.constant 0 : index
    %c0_30 = arith.constant 0 : index
    %84 = vector.load %arg6[%83, %c0_29, %c0_30] : memref<8x8x128xf32, #tpu.memory_space<vmem>>, vector<1x8x128xf32>
    %85 = vector.shape_cast %84 : vector<1x8x128xf32> to vector<8x128xf32>
    %86 = vector.shape_cast %82 : vector<8x128xf32> to vector<1x8x128xf32>
    tpu.vector_store %arg6[%83, %c0_29, %c0_30], %86 {strides = array<i32>} : memref<8x8x128xf32, #tpu.memory_space<vmem>>, vector<1x8x128xf32>,
    %c2_i32 = arith.constant 2 : i32
    %87 = arith.index_cast %c2_i32 : i32 to index
    %c0_31 = arith.constant 0 : index
    %c0_32 = arith.constant 0 : index
    %88 = vector.load %arg2[%87, %c0_31, %c0_32] : memref<8x8x384xbf16, #tpu.memory_space<vmem>>, vector<1x8x384xbf16>
    %89 = vector.shape_cast %88 : vector<1x8x384xbf16> to vector<8x384xbf16>
    %90 = arith.extf %89 : vector<8x384xbf16> to vector<8x384xf32>
    %91 = arith.truncf %82 : vector<8x128xf32> to vector<8x128xbf16>
    %cst_33 = arith.constant dense<0.000000e+00> : vector<8x256xf32>
    %92 = tpu.matmul %91, %3, %cst_33 {dimension_numbers = #tpu.dot_dimension_numbers<[1], [0], [0], [1], [0, 0, 1, 1], [], []>} : vector<8x128xbf16>, vector<128x256xbf16>, vector<8x256xf32> -> vector<8x256xf32>
    %cst_34 = arith.constant dense<0.000000e+00> : vector<8x128xf32>
    %93 = tpu.matmul %91, %4, %cst_34 {dimension_numbers = #tpu.dot_dimension_numbers<[1], [0], [0], [1], [0, 0, 1, 1], [], []>} : vector<8x128xbf16>, vector<128x128xbf16>, vector<8x128xf32> -> vector<8x128xf32>
    %94 = vector.extract_strided_slice %90 {offsets = [0, 0], sizes = [8, 128], strides = [1, 1]} : vector<8x384xf32> to vector<8x128xf32>
    %95 = vector.extract_strided_slice %92 {offsets = [0, 0], sizes = [8, 128], strides = [1, 1]} : vector<8x256xf32> to vector<8x128xf32>
    %96 = arith.addf %94, %95 : vector<8x128xf32>
    %cst_35 = arith.constant 5.000000e-01 : f32
    %97 = vector.broadcast %cst_35 : f32 to vector<8x128xf32>
    %98 = arith.mulf %97, %96 : vector<8x128xf32>
    %99 = math.tanh %98 : vector<8x128xf32>
    %cst_36 = arith.constant 5.000000e-01 : f32
    %100 = vector.broadcast %cst_36 : f32 to vector<8x128xf32>
    %101 = arith.mulf %100, %99 : vector<8x128xf32>
    %cst_37 = arith.constant 5.000000e-01 : f32
    %102 = vector.broadcast %cst_37 : f32 to vector<8x128xf32>
    %103 = arith.addf %101, %102 : vector<8x128xf32>
    %104 = vector.extract_strided_slice %90 {offsets = [0, 128], sizes = [8, 128], strides = [1, 1]} : vector<8x384xf32> to vector<8x128xf32>
    %105 = vector.extract_strided_slice %92 {offsets = [0, 128], sizes = [8, 128], strides = [1, 1]} : vector<8x256xf32> to vector<8x128xf32>
    %106 = arith.addf %104, %105 : vector<8x128xf32>
    %cst_38 = arith.constant 5.000000e-01 : f32
    %107 = vector.broadcast %cst_38 : f32 to vector<8x128xf32>
    %108 = arith.mulf %107, %106 : vector<8x128xf32>
    %109 = math.tanh %108 : vector<8x128xf32>
    %cst_39 = arith.constant 5.000000e-01 : f32
    %110 = vector.broadcast %cst_39 : f32 to vector<8x128xf32>
    %111 = arith.mulf %110, %109 : vector<8x128xf32>
    %cst_40 = arith.constant 5.000000e-01 : f32
    %112 = vector.broadcast %cst_40 : f32 to vector<8x128xf32>
    %113 = arith.addf %111, %112 : vector<8x128xf32>
    %114 = vector.extract_strided_slice %90 {offsets = [0, 256], sizes = [8, 128], strides = [1, 1]} : vector<8x384xf32> to vector<8x128xf32>
    %115 = arith.addf %93, %7 : vector<8x128xf32>
    %116 = arith.mulf %103, %115 : vector<8x128xf32>
    %117 = arith.addf %114, %116 : vector<8x128xf32>
    %118 = math.tanh %117 : vector<8x128xf32>
    %119 = arith.subf %82, %118 : vector<8x128xf32>
    %120 = arith.mulf %113, %119 : vector<8x128xf32>
    %121 = arith.addf %118, %120 : vector<8x128xf32>
    %122 = arith.index_cast %c2_i32 : i32 to index
    %c0_41 = arith.constant 0 : index
    %c0_42 = arith.constant 0 : index
    %123 = vector.load %arg6[%122, %c0_41, %c0_42] : memref<8x8x128xf32, #tpu.memory_space<vmem>>, vector<1x8x128xf32>
    %124 = vector.shape_cast %123 : vector<1x8x128xf32> to vector<8x128xf32>
    %125 = vector.shape_cast %121 : vector<8x128xf32> to vector<1x8x128xf32>
    tpu.vector_store %arg6[%122, %c0_41, %c0_42], %125 {strides = array<i32>} : memref<8x8x128xf32, #tpu.memory_space<vmem>>, vector<1x8x128xf32>,
    %c3_i32 = arith.constant 3 : i32
    %126 = arith.index_cast %c3_i32 : i32 to index
    %c0_43 = arith.constant 0 : index
    %c0_44 = arith.constant 0 : index
    %127 = vector.load %arg2[%126, %c0_43, %c0_44] : memref<8x8x384xbf16, #tpu.memory_space<vmem>>, vector<1x8x384xbf16>
    %128 = vector.shape_cast %127 : vector<1x8x384xbf16> to vector<8x384xbf16>
    %129 = arith.extf %128 : vector<8x384xbf16> to vector<8x384xf32>
    %130 = arith.truncf %121 : vector<8x128xf32> to vector<8x128xbf16>
    %cst_45 = arith.constant dense<0.000000e+00> : vector<8x256xf32>
    %131 = tpu.matmul %130, %3, %cst_45 {dimension_numbers = #tpu.dot_dimension_numbers<[1], [0], [0], [1], [0, 0, 1, 1], [], []>} : vector<8x128xbf16>, vector<128x256xbf16>, vector<8x256xf32> -> vector<8x256xf32>
    %cst_46 = arith.constant dense<0.000000e+00> : vector<8x128xf32>
    %132 = tpu.matmul %130, %4, %cst_46 {dimension_numbers = #tpu.dot_dimension_numbers<[1], [0], [0], [1], [0, 0, 1, 1], [], []>} : vector<8x128xbf16>, vector<128x128xbf16>, vector<8x128xf32> -> vector<8x128xf32>
    %133 = vector.extract_strided_slice %129 {offsets = [0, 0], sizes = [8, 128], strides = [1, 1]} : vector<8x384xf32> to vector<8x128xf32>
    %134 = vector.extract_strided_slice %131 {offsets = [0, 0], sizes = [8, 128], strides = [1, 1]} : vector<8x256xf32> to vector<8x128xf32>
    %135 = arith.addf %133, %134 : vector<8x128xf32>
    %cst_47 = arith.constant 5.000000e-01 : f32
    %136 = vector.broadcast %cst_47 : f32 to vector<8x128xf32>
    %137 = arith.mulf %136, %135 : vector<8x128xf32>
    %138 = math.tanh %137 : vector<8x128xf32>
    %cst_48 = arith.constant 5.000000e-01 : f32
    %139 = vector.broadcast %cst_48 : f32 to vector<8x128xf32>
    %140 = arith.mulf %139, %138 : vector<8x128xf32>
    %cst_49 = arith.constant 5.000000e-01 : f32
    %141 = vector.broadcast %cst_49 : f32 to vector<8x128xf32>
    %142 = arith.addf %140, %141 : vector<8x128xf32>
    %143 = vector.extract_strided_slice %129 {offsets = [0, 128], sizes = [8, 128], strides = [1, 1]} : vector<8x384xf32> to vector<8x128xf32>
    %144 = vector.extract_strided_slice %131 {offsets = [0, 128], sizes = [8, 128], strides = [1, 1]} : vector<8x256xf32> to vector<8x128xf32>
    %145 = arith.addf %143, %144 : vector<8x128xf32>
    %cst_50 = arith.constant 5.000000e-01 : f32
    %146 = vector.broadcast %cst_50 : f32 to vector<8x128xf32>
    %147 = arith.mulf %146, %145 : vector<8x128xf32>
    %148 = math.tanh %147 : vector<8x128xf32>
    %cst_51 = arith.constant 5.000000e-01 : f32
    %149 = vector.broadcast %cst_51 : f32 to vector<8x128xf32>
    %150 = arith.mulf %149, %148 : vector<8x128xf32>
    %cst_52 = arith.constant 5.000000e-01 : f32
    %151 = vector.broadcast %cst_52 : f32 to vector<8x128xf32>
    %152 = arith.addf %150, %151 : vector<8x128xf32>
    %153 = vector.extract_strided_slice %129 {offsets = [0, 256], sizes = [8, 128], strides = [1, 1]} : vector<8x384xf32> to vector<8x128xf32>
    %154 = arith.addf %132, %7 : vector<8x128xf32>
    %155 = arith.mulf %142, %154 : vector<8x128xf32>
    %156 = arith.addf %153, %155 : vector<8x128xf32>
    %157 = math.tanh %156 : vector<8x128xf32>
    %158 = arith.subf %121, %157 : vector<8x128xf32>
    %159 = arith.mulf %152, %158 : vector<8x128xf32>
    %160 = arith.addf %157, %159 : vector<8x128xf32>
    %161 = arith.index_cast %c3_i32 : i32 to index
    %c0_53 = arith.constant 0 : index
    %c0_54 = arith.constant 0 : index
    %162 = vector.load %arg6[%161, %c0_53, %c0_54] : memref<8x8x128xf32, #tpu.memory_space<vmem>>, vector<1x8x128xf32>
    %163 = vector.shape_cast %162 : vector<1x8x128xf32> to vector<8x128xf32>
    %164 = vector.shape_cast %160 : vector<8x128xf32> to vector<1x8x128xf32>
    tpu.vector_store %arg6[%161, %c0_53, %c0_54], %164 {strides = array<i32>} : memref<8x8x128xf32, #tpu.memory_space<vmem>>, vector<1x8x128xf32>,
    %c4_i32 = arith.constant 4 : i32
    %165 = arith.index_cast %c4_i32 : i32 to index
    %c0_55 = arith.constant 0 : index
    %c0_56 = arith.constant 0 : index
    %166 = vector.load %arg2[%165, %c0_55, %c0_56] : memref<8x8x384xbf16, #tpu.memory_space<vmem>>, vector<1x8x384xbf16>
    %167 = vector.shape_cast %166 : vector<1x8x384xbf16> to vector<8x384xbf16>
    %168 = arith.extf %167 : vector<8x384xbf16> to vector<8x384xf32>
    %169 = arith.truncf %160 : vector<8x128xf32> to vector<8x128xbf16>
    %cst_57 = arith.constant dense<0.000000e+00> : vector<8x256xf32>
    %170 = tpu.matmul %169, %3, %cst_57 {dimension_numbers = #tpu.dot_dimension_numbers<[1], [0], [0], [1], [0, 0, 1, 1], [], []>} : vector<8x128xbf16>, vector<128x256xbf16>, vector<8x256xf32> -> vector<8x256xf32>
    %cst_58 = arith.constant dense<0.000000e+00> : vector<8x128xf32>
    %171 = tpu.matmul %169, %4, %cst_58 {dimension_numbers = #tpu.dot_dimension_numbers<[1], [0], [0], [1], [0, 0, 1, 1], [], []>} : vector<8x128xbf16>, vector<128x128xbf16>, vector<8x128xf32> -> vector<8x128xf32>
    %172 = vector.extract_strided_slice %168 {offsets = [0, 0], sizes = [8, 128], strides = [1, 1]} : vector<8x384xf32> to vector<8x128xf32>
    %173 = vector.extract_strided_slice %170 {offsets = [0, 0], sizes = [8, 128], strides = [1, 1]} : vector<8x256xf32> to vector<8x128xf32>
    %174 = arith.addf %172, %173 : vector<8x128xf32>
    %cst_59 = arith.constant 5.000000e-01 : f32
    %175 = vector.broadcast %cst_59 : f32 to vector<8x128xf32>
    %176 = arith.mulf %175, %174 : vector<8x128xf32>
    %177 = math.tanh %176 : vector<8x128xf32>
    %cst_60 = arith.constant 5.000000e-01 : f32
    %178 = vector.broadcast %cst_60 : f32 to vector<8x128xf32>
    %179 = arith.mulf %178, %177 : vector<8x128xf32>
    %cst_61 = arith.constant 5.000000e-01 : f32
    %180 = vector.broadcast %cst_61 : f32 to vector<8x128xf32>
    %181 = arith.addf %179, %180 : vector<8x128xf32>
    %182 = vector.extract_strided_slice %168 {offsets = [0, 128], sizes = [8, 128], strides = [1, 1]} : vector<8x384xf32> to vector<8x128xf32>
    %183 = vector.extract_strided_slice %170 {offsets = [0, 128], sizes = [8, 128], strides = [1, 1]} : vector<8x256xf32> to vector<8x128xf32>
    %184 = arith.addf %182, %183 : vector<8x128xf32>
    %cst_62 = arith.constant 5.000000e-01 : f32
    %185 = vector.broadcast %cst_62 : f32 to vector<8x128xf32>
    %186 = arith.mulf %185, %184 : vector<8x128xf32>
    %187 = math.tanh %186 : vector<8x128xf32>
    %cst_63 = arith.constant 5.000000e-01 : f32
    %188 = vector.broadcast %cst_63 : f32 to vector<8x128xf32>
    %189 = arith.mulf %188, %187 : vector<8x128xf32>
    %cst_64 = arith.constant 5.000000e-01 : f32
    %190 = vector.broadcast %cst_64 : f32 to vector<8x128xf32>
    %191 = arith.addf %189, %190 : vector<8x128xf32>
    %192 = vector.extract_strided_slice %168 {offsets = [0, 256], sizes = [8, 128], strides = [1, 1]} : vector<8x384xf32> to vector<8x128xf32>
    %193 = arith.addf %171, %7 : vector<8x128xf32>
    %194 = arith.mulf %181, %193 : vector<8x128xf32>
    %195 = arith.addf %192, %194 : vector<8x128xf32>
    %196 = math.tanh %195 : vector<8x128xf32>
    %197 = arith.subf %160, %196 : vector<8x128xf32>
    %198 = arith.mulf %191, %197 : vector<8x128xf32>
    %199 = arith.addf %196, %198 : vector<8x128xf32>
    %200 = arith.index_cast %c4_i32 : i32 to index
    %c0_65 = arith.constant 0 : index
    %c0_66 = arith.constant 0 : index
    %201 = vector.load %arg6[%200, %c0_65, %c0_66] : memref<8x8x128xf32, #tpu.memory_space<vmem>>, vector<1x8x128xf32>
    %202 = vector.shape_cast %201 : vector<1x8x128xf32> to vector<8x128xf32>
    %203 = vector.shape_cast %199 : vector<8x128xf32> to vector<1x8x128xf32>
    tpu.vector_store %arg6[%200, %c0_65, %c0_66], %203 {strides = array<i32>} : memref<8x8x128xf32, #tpu.memory_space<vmem>>, vector<1x8x128xf32>,
    %c5_i32 = arith.constant 5 : i32
    %204 = arith.index_cast %c5_i32 : i32 to index
    %c0_67 = arith.constant 0 : index
    %c0_68 = arith.constant 0 : index
    %205 = vector.load %arg2[%204, %c0_67, %c0_68] : memref<8x8x384xbf16, #tpu.memory_space<vmem>>, vector<1x8x384xbf16>
    %206 = vector.shape_cast %205 : vector<1x8x384xbf16> to vector<8x384xbf16>
    %207 = arith.extf %206 : vector<8x384xbf16> to vector<8x384xf32>
    %208 = arith.truncf %199 : vector<8x128xf32> to vector<8x128xbf16>
    %cst_69 = arith.constant dense<0.000000e+00> : vector<8x256xf32>
    %209 = tpu.matmul %208, %3, %cst_69 {dimension_numbers = #tpu.dot_dimension_numbers<[1], [0], [0], [1], [0, 0, 1, 1], [], []>} : vector<8x128xbf16>, vector<128x256xbf16>, vector<8x256xf32> -> vector<8x256xf32>
    %cst_70 = arith.constant dense<0.000000e+00> : vector<8x128xf32>
    %210 = tpu.matmul %208, %4, %cst_70 {dimension_numbers = #tpu.dot_dimension_numbers<[1], [0], [0], [1], [0, 0, 1, 1], [], []>} : vector<8x128xbf16>, vector<128x128xbf16>, vector<8x128xf32> -> vector<8x128xf32>
    %211 = vector.extract_strided_slice %207 {offsets = [0, 0], sizes = [8, 128], strides = [1, 1]} : vector<8x384xf32> to vector<8x128xf32>
    %212 = vector.extract_strided_slice %209 {offsets = [0, 0], sizes = [8, 128], strides = [1, 1]} : vector<8x256xf32> to vector<8x128xf32>
    %213 = arith.addf %211, %212 : vector<8x128xf32>
    %cst_71 = arith.constant 5.000000e-01 : f32
    %214 = vector.broadcast %cst_71 : f32 to vector<8x128xf32>
    %215 = arith.mulf %214, %213 : vector<8x128xf32>
    %216 = math.tanh %215 : vector<8x128xf32>
    %cst_72 = arith.constant 5.000000e-01 : f32
    %217 = vector.broadcast %cst_72 : f32 to vector<8x128xf32>
    %218 = arith.mulf %217, %216 : vector<8x128xf32>
    %cst_73 = arith.constant 5.000000e-01 : f32
    %219 = vector.broadcast %cst_73 : f32 to vector<8x128xf32>
    %220 = arith.addf %218, %219 : vector<8x128xf32>
    %221 = vector.extract_strided_slice %207 {offsets = [0, 128], sizes = [8, 128], strides = [1, 1]} : vector<8x384xf32> to vector<8x128xf32>
    %222 = vector.extract_strided_slice %209 {offsets = [0, 128], sizes = [8, 128], strides = [1, 1]} : vector<8x256xf32> to vector<8x128xf32>
    %223 = arith.addf %221, %222 : vector<8x128xf32>
    %cst_74 = arith.constant 5.000000e-01 : f32
    %224 = vector.broadcast %cst_74 : f32 to vector<8x128xf32>
    %225 = arith.mulf %224, %223 : vector<8x128xf32>
    %226 = math.tanh %225 : vector<8x128xf32>
    %cst_75 = arith.constant 5.000000e-01 : f32
    %227 = vector.broadcast %cst_75 : f32 to vector<8x128xf32>
    %228 = arith.mulf %227, %226 : vector<8x128xf32>
    %cst_76 = arith.constant 5.000000e-01 : f32
    %229 = vector.broadcast %cst_76 : f32 to vector<8x128xf32>
    %230 = arith.addf %228, %229 : vector<8x128xf32>
    %231 = vector.extract_strided_slice %207 {offsets = [0, 256], sizes = [8, 128], strides = [1, 1]} : vector<8x384xf32> to vector<8x128xf32>
    %232 = arith.addf %210, %7 : vector<8x128xf32>
    %233 = arith.mulf %220, %232 : vector<8x128xf32>
    %234 = arith.addf %231, %233 : vector<8x128xf32>
    %235 = math.tanh %234 : vector<8x128xf32>
    %236 = arith.subf %199, %235 : vector<8x128xf32>
    %237 = arith.mulf %230, %236 : vector<8x128xf32>
    %238 = arith.addf %235, %237 : vector<8x128xf32>
    %239 = arith.index_cast %c5_i32 : i32 to index
    %c0_77 = arith.constant 0 : index
    %c0_78 = arith.constant 0 : index
    %240 = vector.load %arg6[%239, %c0_77, %c0_78] : memref<8x8x128xf32, #tpu.memory_space<vmem>>, vector<1x8x128xf32>
    %241 = vector.shape_cast %240 : vector<1x8x128xf32> to vector<8x128xf32>
    %242 = vector.shape_cast %238 : vector<8x128xf32> to vector<1x8x128xf32>
    tpu.vector_store %arg6[%239, %c0_77, %c0_78], %242 {strides = array<i32>} : memref<8x8x128xf32, #tpu.memory_space<vmem>>, vector<1x8x128xf32>,
    %c6_i32 = arith.constant 6 : i32
    %243 = arith.index_cast %c6_i32 : i32 to index
    %c0_79 = arith.constant 0 : index
    %c0_80 = arith.constant 0 : index
    %244 = vector.load %arg2[%243, %c0_79, %c0_80] : memref<8x8x384xbf16, #tpu.memory_space<vmem>>, vector<1x8x384xbf16>
    %245 = vector.shape_cast %244 : vector<1x8x384xbf16> to vector<8x384xbf16>
    %246 = arith.extf %245 : vector<8x384xbf16> to vector<8x384xf32>
    %247 = arith.truncf %238 : vector<8x128xf32> to vector<8x128xbf16>
    %cst_81 = arith.constant dense<0.000000e+00> : vector<8x256xf32>
    %248 = tpu.matmul %247, %3, %cst_81 {dimension_numbers = #tpu.dot_dimension_numbers<[1], [0], [0], [1], [0, 0, 1, 1], [], []>} : vector<8x128xbf16>, vector<128x256xbf16>, vector<8x256xf32> -> vector<8x256xf32>
    %cst_82 = arith.constant dense<0.000000e+00> : vector<8x128xf32>
    %249 = tpu.matmul %247, %4, %cst_82 {dimension_numbers = #tpu.dot_dimension_numbers<[1], [0], [0], [1], [0, 0, 1, 1], [], []>} : vector<8x128xbf16>, vector<128x128xbf16>, vector<8x128xf32> -> vector<8x128xf32>
    %250 = vector.extract_strided_slice %246 {offsets = [0, 0], sizes = [8, 128], strides = [1, 1]} : vector<8x384xf32> to vector<8x128xf32>
    %251 = vector.extract_strided_slice %248 {offsets = [0, 0], sizes = [8, 128], strides = [1, 1]} : vector<8x256xf32> to vector<8x128xf32>
    %252 = arith.addf %250, %251 : vector<8x128xf32>
    %cst_83 = arith.constant 5.000000e-01 : f32
    %253 = vector.broadcast %cst_83 : f32 to vector<8x128xf32>
    %254 = arith.mulf %253, %252 : vector<8x128xf32>
    %255 = math.tanh %254 : vector<8x128xf32>
    %cst_84 = arith.constant 5.000000e-01 : f32
    %256 = vector.broadcast %cst_84 : f32 to vector<8x128xf32>
    %257 = arith.mulf %256, %255 : vector<8x128xf32>
    %cst_85 = arith.constant 5.000000e-01 : f32
    %258 = vector.broadcast %cst_85 : f32 to vector<8x128xf32>
    %259 = arith.addf %257, %258 : vector<8x128xf32>
    %260 = vector.extract_strided_slice %246 {offsets = [0, 128], sizes = [8, 128], strides = [1, 1]} : vector<8x384xf32> to vector<8x128xf32>
    %261 = vector.extract_strided_slice %248 {offsets = [0, 128], sizes = [8, 128], strides = [1, 1]} : vector<8x256xf32> to vector<8x128xf32>
    %262 = arith.addf %260, %261 : vector<8x128xf32>
    %cst_86 = arith.constant 5.000000e-01 : f32
    %263 = vector.broadcast %cst_86 : f32 to vector<8x128xf32>
    %264 = arith.mulf %263, %262 : vector<8x128xf32>
    %265 = math.tanh %264 : vector<8x128xf32>
    %cst_87 = arith.constant 5.000000e-01 : f32
    %266 = vector.broadcast %cst_87 : f32 to vector<8x128xf32>
    %267 = arith.mulf %266, %265 : vector<8x128xf32>
    %cst_88 = arith.constant 5.000000e-01 : f32
    %268 = vector.broadcast %cst_88 : f32 to vector<8x128xf32>
    %269 = arith.addf %267, %268 : vector<8x128xf32>
    %270 = vector.extract_strided_slice %246 {offsets = [0, 256], sizes = [8, 128], strides = [1, 1]} : vector<8x384xf32> to vector<8x128xf32>
    %271 = arith.addf %249, %7 : vector<8x128xf32>
    %272 = arith.mulf %259, %271 : vector<8x128xf32>
    %273 = arith.addf %270, %272 : vector<8x128xf32>
    %274 = math.tanh %273 : vector<8x128xf32>
    %275 = arith.subf %238, %274 : vector<8x128xf32>
    %276 = arith.mulf %269, %275 : vector<8x128xf32>
    %277 = arith.addf %274, %276 : vector<8x128xf32>
    %278 = arith.index_cast %c6_i32 : i32 to index
    %c0_89 = arith.constant 0 : index
    %c0_90 = arith.constant 0 : index
    %279 = vector.load %arg6[%278, %c0_89, %c0_90] : memref<8x8x128xf32, #tpu.memory_space<vmem>>, vector<1x8x128xf32>
    %280 = vector.shape_cast %279 : vector<1x8x128xf32> to vector<8x128xf32>
    %281 = vector.shape_cast %277 : vector<8x128xf32> to vector<1x8x128xf32>
    tpu.vector_store %arg6[%278, %c0_89, %c0_90], %281 {strides = array<i32>} : memref<8x8x128xf32, #tpu.memory_space<vmem>>, vector<1x8x128xf32>,
    %c7_i32 = arith.constant 7 : i32
    %282 = arith.index_cast %c7_i32 : i32 to index
    %c0_91 = arith.constant 0 : index
    %c0_92 = arith.constant 0 : index
    %283 = vector.load %arg2[%282, %c0_91, %c0_92] : memref<8x8x384xbf16, #tpu.memory_space<vmem>>, vector<1x8x384xbf16>
    %284 = vector.shape_cast %283 : vector<1x8x384xbf16> to vector<8x384xbf16>
    %285 = arith.extf %284 : vector<8x384xbf16> to vector<8x384xf32>
    %286 = arith.truncf %277 : vector<8x128xf32> to vector<8x128xbf16>
    %cst_93 = arith.constant dense<0.000000e+00> : vector<8x256xf32>
    %287 = tpu.matmul %286, %3, %cst_93 {dimension_numbers = #tpu.dot_dimension_numbers<[1], [0], [0], [1], [0, 0, 1, 1], [], []>} : vector<8x128xbf16>, vector<128x256xbf16>, vector<8x256xf32> -> vector<8x256xf32>
    %cst_94 = arith.constant dense<0.000000e+00> : vector<8x128xf32>
    %288 = tpu.matmul %286, %4, %cst_94 {dimension_numbers = #tpu.dot_dimension_numbers<[1], [0], [0], [1], [0, 0, 1, 1], [], []>} : vector<8x128xbf16>, vector<128x128xbf16>, vector<8x128xf32> -> vector<8x128xf32>
    %289 = vector.extract_strided_slice %285 {offsets = [0, 0], sizes = [8, 128], strides = [1, 1]} : vector<8x384xf32> to vector<8x128xf32>
    %290 = vector.extract_strided_slice %287 {offsets = [0, 0], sizes = [8, 128], strides = [1, 1]} : vector<8x256xf32> to vector<8x128xf32>
    %291 = arith.addf %289, %290 : vector<8x128xf32>
    %cst_95 = arith.constant 5.000000e-01 : f32
    %292 = vector.broadcast %cst_95 : f32 to vector<8x128xf32>
    %293 = arith.mulf %292, %291 : vector<8x128xf32>
    %294 = math.tanh %293 : vector<8x128xf32>
    %cst_96 = arith.constant 5.000000e-01 : f32
    %295 = vector.broadcast %cst_96 : f32 to vector<8x128xf32>
    %296 = arith.mulf %295, %294 : vector<8x128xf32>
    %cst_97 = arith.constant 5.000000e-01 : f32
    %297 = vector.broadcast %cst_97 : f32 to vector<8x128xf32>
    %298 = arith.addf %296, %297 : vector<8x128xf32>
    %299 = vector.extract_strided_slice %285 {offsets = [0, 128], sizes = [8, 128], strides = [1, 1]} : vector<8x384xf32> to vector<8x128xf32>
    %300 = vector.extract_strided_slice %287 {offsets = [0, 128], sizes = [8, 128], strides = [1, 1]} : vector<8x256xf32> to vector<8x128xf32>
    %301 = arith.addf %299, %300 : vector<8x128xf32>
    %cst_98 = arith.constant 5.000000e-01 : f32
    %302 = vector.broadcast %cst_98 : f32 to vector<8x128xf32>
    %303 = arith.mulf %302, %301 : vector<8x128xf32>
    %304 = math.tanh %303 : vector<8x128xf32>
    %cst_99 = arith.constant 5.000000e-01 : f32
    %305 = vector.broadcast %cst_99 : f32 to vector<8x128xf32>
    %306 = arith.mulf %305, %304 : vector<8x128xf32>
    %cst_100 = arith.constant 5.000000e-01 : f32
    %307 = vector.broadcast %cst_100 : f32 to vector<8x128xf32>
    %308 = arith.addf %306, %307 : vector<8x128xf32>
    %309 = vector.extract_strided_slice %285 {offsets = [0, 256], sizes = [8, 128], strides = [1, 1]} : vector<8x384xf32> to vector<8x128xf32>
    %310 = arith.addf %288, %7 : vector<8x128xf32>
    %311 = arith.mulf %298, %310 : vector<8x128xf32>
    %312 = arith.addf %309, %311 : vector<8x128xf32>
    %313 = math.tanh %312 : vector<8x128xf32>
    %314 = arith.subf %277, %313 : vector<8x128xf32>
    %315 = arith.mulf %308, %314 : vector<8x128xf32>
    %316 = arith.addf %313, %315 : vector<8x128xf32>
    %317 = arith.index_cast %c7_i32 : i32 to index
    %c0_101 = arith.constant 0 : index
    %c0_102 = arith.constant 0 : index
    %318 = vector.load %arg6[%317, %c0_101, %c0_102] : memref<8x8x128xf32, #tpu.memory_space<vmem>>, vector<1x8x128xf32>
    %319 = vector.shape_cast %318 : vector<1x8x128xf32> to vector<8x128xf32>
    %320 = vector.shape_cast %316 : vector<8x128xf32> to vector<1x8x128xf32>
    tpu.vector_store %arg6[%317, %c0_101, %c0_102], %320 {strides = array<i32>} : memref<8x8x128xf32, #tpu.memory_space<vmem>>, vector<1x8x128xf32>,
    %c8_i32 = arith.constant 8 : i32
    %c0_103 = arith.constant 0 : index
    %c0_104 = arith.constant 0 : index
    %321 = vector.load %arg8[%c0_103, %c0_104] : memref<8x128xf32, #tpu.memory_space<vmem>>, vector<8x128xf32>
    tpu.vector_store %arg8[%c0_103, %c0_104], %316 {strides = array<i32>} : memref<8x128xf32, #tpu.memory_space<vmem>>, vector<8x128xf32>,
    %c0_i32_105 = arith.constant 0 : i32
    %322 = arith.cmpi eq, %arg1, %c0_i32_105 : i32
    %323 = arith.extui %322 : i1 to i32
    %c0_i32_106 = arith.constant 0 : i32
    %324 = arith.cmpi ne, %323, %c0_i32_106 : i32
    scf.if %324 {
      %c0_107 = arith.constant 0 : index
      %c0_108 = arith.constant 0 : index
      %325 = vector.load %arg7[%c0_107, %c0_108] : memref<8x128xf32, #tpu.memory_space<vmem>>, vector<8x128xf32>
      tpu.vector_store %arg7[%c0_107, %c0_108], %316 {strides = array<i32>} : memref<8x128xf32, #tpu.memory_space<vmem>>, vector<8x128xf32>,
    } else {
    }
    return
  }
  func.func @transform_0(%arg0: i32, %arg1: i32) -> (i32, i32, i32) {
    %c0_i32 = arith.constant 0 : i32
    %c0_i32_0 = arith.constant 0 : i32
    return %arg1, %arg0, %c0_i32 : i32, i32, i32
  }
  func.func @transform_1(%arg0: i32, %arg1: i32) -> (i32, i32) {
    %c0_i32 = arith.constant 0 : i32
    %c0_i32_0 = arith.constant 0 : i32
    %c0_i32_1 = arith.constant 0 : i32
    return %c0_i32, %c0_i32_0 : i32, i32
  }
  func.func @transform_2(%arg0: i32, %arg1: i32) -> (i32, i32) {
    %c0_i32 = arith.constant 0 : i32
    %c0_i32_0 = arith.constant 0 : i32
    %c0_i32_1 = arith.constant 0 : i32
    return %c0_i32, %c0_i32_0 : i32, i32
  }
  func.func @transform_3(%arg0: i32, %arg1: i32) -> (i32, i32) {
    %c0_i32 = arith.constant 0 : i32
    %c0_i32_0 = arith.constant 0 : i32
    return %arg0, %c0_i32 : i32, i32
  }
  func.func @transform_4(%arg0: i32, %arg1: i32) -> (i32, i32, i32) {
    %c0_i32 = arith.constant 0 : i32
    %c0_i32_0 = arith.constant 0 : i32
    return %arg1, %arg0, %c0_i32 : i32, i32, i32
  }
  func.func @transform_5(%arg0: i32, %arg1: i32) -> (i32, i32) {
    %c0_i32 = arith.constant 0 : i32
    %c0_i32_0 = arith.constant 0 : i32
    return %arg0, %c0_i32 : i32, i32
  }
}

</mosaic_0001>

<bundles_post_ra>
// kernel: tpu_custom_call.1
= control target key start
LH: loop header
LB: loop body
LE: loop exit
PB: predicated region body
PF: predicated region fallthrough
CT: control target
= control target key end

     0   :  { %11 = vsyncpa [#allocation4], 0  ;;  %s2026_s0 = inlined_call_operand.hbm [shape: bf16[8,8,384], index: 0, kind: input, shape index: {}]   ;;  %s2027_s1 = inlined_call_operand.hbm [shape: bf16[128,384], index: 1, kind: input, shape index: {}]   ;;  %s2028_s2 = inlined_call_operand.vmem [shape: f32[1,128], index: 2, kind: input, shape index: {}]   ;;  %s2029_s3 = inlined_call_operand.hbm [shape: f32[8,128], index: 3, kind: input, shape index: {}]   ;;  %s2030_s4 = inlined_call_operand.hbm [shape: f32[8,8,128], index: 4, kind: output, shape index: {0}]   ;;  %s2031_s5 = inlined_call_operand.hbm [shape: f32[8,128], index: 5, kind: output, shape index: {1}]  }
   0x1   :  { %12 = vsyncpa [#allocation7], 0 }
   0x2   :  { %13 = vsyncpa [#allocation5], 0 }
   0x3   :  { %14 = vsyncpa [#allocation11], 0  ;;  %s1579_s18 = smov [#allocation6]   ;;  %s1580_s20 = smov [#allocation3]  }
   0x4   :  { %s32_s19 = sshll.u32 %s1579_s18, 4  ;;  %s20_s21 = sshll.u32 %s1580_s20, 4  ;;  %s33_s19 = int_to_ptr.vmem [resolvable:$true] %s32_s19  ;;  %s21_s21 = int_to_ptr.vmem [resolvable:$true] %s20_s21 }
   0x5   :  { %s1479_s22 = scalar_lea.vmem %s33_s19, 3072  ;;  %p1484_p1 = scmp.lt.s32.totalorder %s33_s19, %s33_s19 }
   0x6   :  { %p1480_p0 = scmp.ne.s32.totalorder %s33_s19, %s1479_s22  ;;  %p1485_p2 = scmp.lt.s32.totalorder %s1479_s22, %s1479_s22 }
   0x8   :  { %p1486_p3 = por %p1485_p2, %p1484_p1 }
   0xa   :  { %p1487_p4 = pnand %p1486_p3, %p1480_p0 }
   0xc   :  { %1490 = shalt.err (!%p1487_p4)
}
   0xd   :  { %s1581_s23 = smov 192   ;;  %s1582_s24 = smov 12  }
   0xe   :  { %38 = dma.hbm_to_vmem [thread:$0]  %s2027_s1, 3072, %s33_s19, [#allocation7], %s1581_s23, %s1581_s23, %s1582_s24  }
   0xf   :  { %s1499_s27 = scalar_lea.vmem %s21_s21, 1536  ;;  %p1504_p6 = scmp.lt.s32.totalorder %s21_s21, %s21_s21 }
  0x10   :  { %p1500_p5 = scmp.ne.s32.totalorder %s21_s21, %s1499_s27  ;;  %p1505_p7 = scmp.lt.s32.totalorder %s1499_s27, %s1499_s27 }
  0x12   :  { %p1506_p8 = por %p1505_p7, %p1504_p6 }
  0x14   :  { %p1507_p9 = pnand %p1506_p8, %p1500_p5 }
  0x16   :  { %1510 = shalt.err (!%p1507_p9)
}
  0x17   :  { %26 = dma.hbm_to_vmem [thread:$0]  %s2026_s0, 1536, %s21_s21, [#allocation4], %s1581_s23, %s1581_s23, %s1582_s24  }
  0x18   :  { %s1583_s30 = smov [#allocation8]  }
  0x19   :  { %s47_s6 = sshll.u32 %s1583_s30, 4  ;;  %s48_s6 = int_to_ptr.vmem [resolvable:$true] %s47_s6 }
  0x1a   :  { %s1519_s7 = scalar_lea.vmem %s48_s6, 128  ;;  %p1524_p11 = scmp.lt.s32.totalorder %s48_s6, %s48_s6 }
  0x1b   :  { %p1520_p10 = scmp.ne.s32.totalorder %s48_s6, %s1519_s7  ;;  %p1525_p12 = scmp.lt.s32.totalorder %s1519_s7, %s1519_s7 }
  0x1d   :  { %p1526_p13 = por %p1525_p12, %p1524_p11 }
  0x1f   :  { %p1527_p0 = pnand %p1526_p13, %p1520_p10 }
  0x21   :  { %1530 = shalt.err (!%p1527_p0)
}
  0x22   :  { %50 = dma.hbm_to_vmem [thread:$0]  %s2029_s3, 128, %s48_s6, [#allocation7]  }
  0x23   :  { %1571 = dma.done.wait [#allocation4], 1536  }
  0x24   :  { %1572 = vsyncadd [#allocation4], 4294965760 }
  0x25   :  { %1573 = dma.done.wait [#allocation7], 3200  }
  0x26   :  { %1574 = vsyncadd [#allocation7], 4294964096  ;;  %v1584_v0 = vmov 0.0   ;;  %v1585_v1 = vmov 0   ;;  %vm1586_vm0 = vmmov 0   ;;  %v1702_v24 = vld [vmem:[#allocation8] sm:$0xff] }
  0x27   :  { %1215 = vmatprep.subr.bf16.mxu1 %v1584_v0  ;;  %225 = vmatprep.mubr.bf16.mxu0 %v1585_v1  ;;  %v1634_v2 = vld [vmem:[#allocation6 + $0xac] ss:$12 sps:$4 sm:$0xff]   ;;  %v1636_v3 = vld [vmem:[#allocation6 + $0xa8] ss:$12 sps:$4 sm:$0xff]   ;;  %v1642_v5 = vld [vmem:[#allocation6 + $0x90] ss:$12 sps:$4 sm:$0xff]   ;;  %v112_v26 = vpack.c.bf16 %v1702_v24, %v1702_v24 }
  0x28   :  { %1231 = vmatprep.mubr.msk.bf16.mxu1 %vm1586_vm0, %v1584_v0  ;;  %193 = vmatprep.subr.bf16.mxu0 %v1634_v2  ;;  %v1639_v4 = vld [vmem:[#allocation6 + $0x94] ss:$12 sps:$4 sm:$0xff]   ;;  %v1645_v6 = vld [vmem:[#allocation6 + $0x7c] ss:$12 sps:$4 sm:$0xff]   ;;  %v1650_v8 = vld [vmem:[#allocation6 + $0x78] ss:$12 sps:$4 sm:$0xff]  }
  0x29   :  { %194 = vmatpush1.bf16.msra.mxu0 %v1636_v3  ;;  %v1647_v7 = vld [vmem:[#allocation6 + $0xb0] ss:$12 sps:$4 sm:$0xff]   ;;  %v1656_v10 = vld [vmem:[#allocation6 + $0x98] ss:$12 sps:$4 sm:$0xff]   ;;  %v1659_v11 = vld [vmem:[#allocation6 + $0x60] ss:$12 sps:$4 sm:$0xff]  }
  0x2a   :  { %195 = vmatprep.subr.bf16.mxu0 %v1639_v4  ;;  %v1652_v9 = vld [vmem:[#allocation6 + $0x64] ss:$12 sps:$4 sm:$0xff]   ;;  %1216 = vmatpush3.bf16.msra.mxu1 %v1647_v7  ;;  %v1662_v12 = vld [vmem:[#allocation6 + $0x4c] ss:$12 sps:$4 sm:$0xff]   ;;  %v1670_v14 = vld [vmem:[#allocation6 + $0x48] ss:$12 sps:$4 sm:$0xff]  }
  0x2b   :  { %1217 = vmatprep.subr.bf16.mxu1 %v1584_v0  ;;  %v1666_v13 = vld [vmem:[#allocation6 + $0x80] ss:$12 sps:$4 sm:$0xff]   ;;  %v1676_v16 = vld [vmem:[#allocation6 + $0x68] ss:$12 sps:$4 sm:$0xff]   ;;  %v1680_v17 = vld [vmem:[#allocation6 + $0x30] ss:$12 sps:$4 sm:$0xff]  }
  0x2c   :  { %v1672_v15 = vld [vmem:[#allocation6 + $0x34] ss:$12 sps:$4 sm:$0xff]   ;;  %v1683_v18 = vld [vmem:[#allocation6 + $0x1c] ss:$12 sps:$4 sm:$0xff]   ;;  %v1690_v20 = vld [vmem:[#allocation6 + $0x18] ss:$12 sps:$4 sm:$0xff]  }
  0x2d   :  { %196 = vmatpush1.bf16.msra.mxu0 %v1642_v5  ;;  %v1686_v19 = vld [vmem:[#allocation6 + $0x50] ss:$12 sps:$4 sm:$0xff]   ;;  %v1696_v22 = vld [vmem:[#allocation6 + $0x38] ss:$12 sps:$4 sm:$0xff]   ;;  %v1700_v23 = vld [vmem:[#allocation6] ss:$12 sps:$4 sm:$0xff]  }
  0x2e   :  { %197 = vmatprep.subr.bf16.mxu0 %v1645_v6  ;;  %1218 = vmatpush3.bf16.msra.mxu1 %v1656_v10  ;;  %v1693_v21 = vld [vmem:[#allocation6 + $0x4] ss:$12 sps:$4 sm:$0xff]   ;;  %v1706_v25 = vld [vmem:[#allocation6 + $0x20] ss:$12 sps:$4 sm:$0xff]   ;;  %v1713_v27 = vld [vmem:[#allocation6 + $0x8] ss:$12 sps:$4 sm:$0xff]  }
  0x2f   :  { %1219 = vmatprep.subr.bf16.mxu1 %v1584_v0  ;;  %v107_v28 = vld [vmem:[#allocation3] sm:$0xff]  ;;  %v1759_v45 = vld [vmem:[#allocation3 + $0x8] ss:$12 sps:$4 sm:$0xff]   ;;  %v340_v60 = vld [vmem:[#allocation3 + $0xc] sm:$0xff]  ;;  %s1588_s10 = smov [#allocation10]  }
  0x30   :  { %v109_v29 = vunpack.c.l.bf16 %v107_v28  ;;  %v110_v38 = vunpack.c.h.bf16 %v107_v28  ;;  %v1757_v42 = vld [vmem:[%s2028_s2] ss:$0 sm:$0xff]  ;;  %v111_v48 = vunpack.c.l.bf16 %v1759_v45  ;;  %v342_v61 = vunpack.c.l.bf16 %v340_v60  ;;  %s1587_s2 = smov [#allocation9]   ;;  %s1104_s11 = sshll.u32 %s1588_s10, 4  ;;  %s1105_s11 = int_to_ptr.vmem [resolvable:$true] %s1104_s11 }
  0x31   :  { %198 = vmatpush1.bf16.msra.mxu0 %v1650_v8  ;;  %s1091_s9 = sshll.u32 %s1587_s2, 4  ;;  %s1092_s9 = int_to_ptr.vmem [resolvable:$true] %s1091_s9 }
  0x32   :  { %199 = vmatprep.subr.bf16.mxu0 %v1652_v9  ;;  %1220 = vmatpush3.bf16.msra.mxu1 %v1666_v13  ;;  %s1531_s12 = scalar_lea.vmem %s1092_s9, 1024  ;;  %p1536_p2 = scmp.lt.s32.totalorder %s1092_s9, %s1092_s9 }
  0x33   :  { %1221 = vmatprep.subr.bf16.mxu1 %v1584_v0  ;;  %p1532_p1 = scmp.ne.s32.totalorder %s1092_s9, %s1531_s12  ;;  %p1537_p3 = scmp.lt.s32.totalorder %s1531_s12, %s1531_s12 }
  0x35   :  { %200 = vmatpush1.bf16.msra.mxu0 %v1659_v11  ;;  %p1538_p4 = por %p1537_p3, %p1536_p2 }
  0x36   :  { %201 = vmatprep.subr.bf16.mxu0 %v1662_v12  ;;  %1222 = vmatpush3.bf16.msra.mxu1 %v1676_v16 }
  0x37   :  { %1223 = vmatprep.subr.bf16.mxu1 %v1584_v0  ;;  %p1539_p5 = pnand %p1538_p4, %p1532_p1 }
  0x39   :  { %202 = vmatpush1.bf16.msra.mxu0 %v1670_v14 }
  0x3a   :  { %203 = vmatprep.subr.bf16.mxu0 %v1672_v15  ;;  %1224 = vmatpush3.bf16.msra.mxu1 %v1686_v19 }
  0x3b   :  { %1225 = vmatprep.subr.bf16.mxu1 %v1584_v0 }
  0x3d   :  { %204 = vmatpush1.bf16.msra.mxu0 %v1680_v17 }
  0x3e   :  { %205 = vmatprep.subr.bf16.mxu0 %v1683_v18  ;;  %1226 = vmatpush3.bf16.msra.mxu1 %v1696_v22 }
  0x3f   :  { %1227 = vmatprep.subr.bf16.mxu1 %v1584_v0 }
  0x41   :  { %206 = vmatpush1.bf16.msra.mxu0 %v1690_v20 }
  0x42   :  { %207 = vmatprep.subr.bf16.mxu0 %v1693_v21  ;;  %1228 = vmatpush3.bf16.msra.mxu1 %v1706_v25 }
  0x43   :  { %1229 = vmatprep.subr.bf16.mxu1 %v1584_v0 }
  0x45   :  { %208 = vmatpush1.bf16.msra.mxu0 %v1700_v23 }
  0x46   :  { %346 = vmatprep.subr.bf16.mxu0 %v1634_v2  ;;  %1230 = vmatpush3.bf16.msra.mxu1 %v1713_v27 }
  0x47   :  { %1235 = vmatprep.subr.bf16.mxu1 %v1584_v0 }
  0x48   :  { %226 = vmatmul.mubr.bf16.vlgmr.msra.gmra.mxu0 %v112_v26 }
  0x49   :  { %347 = vmatpush1.bf16.msra.mxu0 %v1636_v3  ;;  %378 = vmatprep.mubr.bf16.mxu0 %v1585_v1 }
  0x4a   :  { %348 = vmatprep.subr.bf16.mxu0 %v1639_v4  ;;  %1232 = vmatmul.mubr.bf16.vlgmr.msra.gmra.mxu1 %v112_v26 }
  0x4b   :  { %1236 = vmatpush3.bf16.msra.mxu1 %v1647_v7  ;;  %1251 = vmatprep.mubr.msk.bf16.mxu1 %vm1586_vm0, %v1584_v0 }
  0x4c   :  { %1237 = vmatprep.subr.bf16.mxu1 %v1584_v0 }
  0x4d   :  { %349 = vmatpush1.bf16.msra.mxu0 %v1642_v5 }
  0x4e   :  { %350 = vmatprep.subr.bf16.mxu0 %v1645_v6 }
  0x4f   :  { %1238 = vmatpush3.bf16.msra.mxu1 %v1656_v10 }
  0x50   :  { %1239 = vmatprep.subr.bf16.mxu1 %v1584_v0 }
  0x51   :  { %351 = vmatpush1.bf16.msra.mxu0 %v1650_v8 }
  0x52   :  { %352 = vmatprep.subr.bf16.mxu0 %v1652_v9 }
  0x53   :  { %1240 = vmatpush3.bf16.msra.mxu1 %v1666_v13 }
  0x54   :  { %1241 = vmatprep.subr.bf16.mxu1 %v1584_v0 }
  0x55   :  { %353 = vmatpush1.bf16.msra.mxu0 %v1659_v11 }
  0x56   :  { %354 = vmatprep.subr.bf16.mxu0 %v1662_v12 }
  0x57   :  { %1242 = vmatpush3.bf16.msra.mxu1 %v1676_v16 }
  0x58   :  { %1243 = vmatprep.subr.bf16.mxu1 %v1584_v0 }
  0x59   :  { %355 = vmatpush1.bf16.msra.mxu0 %v1670_v14 }
  0x5a   :  { %356 = vmatprep.subr.bf16.mxu0 %v1672_v15 }
  0x5b   :  { %1244 = vmatpush3.bf16.msra.mxu1 %v1686_v19 }
  0x5c   :  { %1245 = vmatprep.subr.bf16.mxu1 %v1584_v0 }
  0x5d   :  { %357 = vmatpush1.bf16.msra.mxu0 %v1680_v17 }
  0x5e   :  { %358 = vmatprep.subr.bf16.mxu0 %v1683_v18 }
  0x5f   :  { %1246 = vmatpush3.bf16.msra.mxu1 %v1696_v22 }
  0x60   :  { %1247 = vmatprep.subr.bf16.mxu1 %v1584_v0 }
  0x61   :  { %359 = vmatpush1.bf16.msra.mxu0 %v1690_v20 }
  0x62   :  { %360 = vmatprep.subr.bf16.mxu0 %v1693_v21 }
  0x63   :  { %1248 = vmatpush3.bf16.msra.mxu1 %v1706_v25 }
  0x64   :  { %1249 = vmatprep.subr.bf16.mxu1 %v1584_v0 }
  0x65   :  { %361 = vmatpush1.bf16.msra.mxu0 %v1700_v23 }
  0x66   :  { %452 = vmatprep.subr.bf16.mxu0 %v1634_v2 }
  0x67   :  { %1250 = vmatpush3.bf16.msra.mxu1 %v1713_v27 }
  0x68   :  { %1255 = vmatprep.subr.bf16.mxu1 %v1584_v0 }
 0x108   :  { %v227_v30 = vpop.f32.mrf.mxu0 }
 0x109   :  { %v234_v31 = vadd.f32 %v227_v30, %v109_v29 }
 0x10a   :  { %v229_v32 = vpop.f32.mrf.mxu0  ;;  %v326_v35 = vpop.f32.mrf.mxu1 }
 0x10b   :  { %v235_v33 = vmul.f32 0.5, %v234_v31  ;;  %v239_v41 = vadd.f32 %v229_v32, %v110_v38  ;;  %v327_v47 = vadd.f32 %v1757_v42, %v326_v35 }
 0x10c   :  { %v231_v34 = vpop.f32.mrf.mxu0  ;;  %v1233_v37 = vpop.f32.mrf.mxu1 }
 0x10d   :  { %1419 = vtanh.f32 %v235_v33  ;;  %v240_v43 = vmul.f32 0.5, %v239_v41  ;;  %v343_v34 = vunpack.c.h.bf16 %v340_v60 }
 0x10e   :  { %v232_v36 = vpop.f32.mrf.mxu0  ;;  %v329_v39 = vpop.f32.mrf.mxu1 }
 0x10f   :  { %1421 = vtanh.f32 %v240_v43  ;;  %v344_v39 = vunpack.c.h.bf16 %v1759_v45 }
 0x110   :  { %v1234_v40 = vpop.f32.mrf.mxu1 }
 0x11a   :  { %v1420_v44 = vpop.eup %1419 }
 0x11b   :  { %v237_v46 = vmul.f32 0.5, %v1420_v44 }
 0x11c   :  { %v1422_v52 = vpop.eup %1421 }
 0x11d   :  { %v238_v49 = vadd.f32 0.5, %v237_v46  ;;  %v242_v53 = vmul.f32 0.5, %v1422_v52 }
 0x11f   :  { %v332_v50 = vmul.f32 %v327_v47, %v238_v49  ;;  %v243_v55 = vadd.f32 0.5, %v242_v53  ;;  %v446_v53 = vld [vmem:[#allocation3 + $0x18] sm:$0xff] }
 0x121   :  { %v333_v51 = vadd.f32 %v332_v50, %v111_v48 }
 0x123   :  { %1423 = vtanh.f32 %v333_v51 }
 0x130   :  { %v1424_v54 = vpop.eup %1423 }
 0x131   :  { %v335_v56 = vsub.f32 %v1702_v24, %v1424_v54 }
 0x133   :  { %v336_v57 = vmul.f32 %v335_v56, %v243_v55 }
 0x135   :  { %v1764_v58 = vadd.f32 %v1424_v54, %v336_v57  ;;  %v448_v54 = vunpack.c.l.bf16 %v446_v53 }
 0x137   :  { %338 = vst [vmem:[#allocation9] sm:$0xff] %v1764_v58  ;;  %v345_v59 = vpack.c.bf16 %v1764_v58, %v1764_v58 }
 0x139   :  { %379 = vmatmul.mubr.bf16.vlgmr.msra.gmra.mxu0 %v345_v59  ;;  %1252 = vmatmul.mubr.bf16.vlgmr.msra.gmra.mxu1 %v345_v59 }
 0x13a   :  { %453 = vmatpush1.bf16.msra.mxu0 %v1636_v3  ;;  %1256 = vmatpush3.bf16.msra.mxu1 %v1647_v7 }
 0x13b   :  { %454 = vmatprep.subr.bf16.mxu0 %v1639_v4  ;;  %1257 = vmatprep.subr.bf16.mxu1 %v1584_v0 }
 0x13c   :  { %484 = vmatprep.mubr.bf16.mxu0 %v1585_v1  ;;  %1271 = vmatprep.mubr.msk.bf16.mxu1 %vm1586_vm0, %v1584_v0 }
 0x13e   :  { %455 = vmatpush1.bf16.msra.mxu0 %v1642_v5  ;;  %1258 = vmatpush3.bf16.msra.mxu1 %v1656_v10 }
 0x13f   :  { %456 = vmatprep.subr.bf16.mxu0 %v1645_v6  ;;  %1259 = vmatprep.subr.bf16.mxu1 %v1584_v0 }
 0x142   :  { %457 = vmatpush1.bf16.msra.mxu0 %v1650_v8  ;;  %1260 = vmatpush3.bf16.msra.mxu1 %v1666_v13 }
 0x143   :  { %458 = vmatprep.subr.bf16.mxu0 %v1652_v9  ;;  %1261 = vmatprep.subr.bf16.mxu1 %v1584_v0 }
 0x146   :  { %459 = vmatpush1.bf16.msra.mxu0 %v1659_v11  ;;  %1262 = vmatpush3.bf16.msra.mxu1 %v1676_v16 }
 0x147   :  { %460 = vmatprep.subr.bf16.mxu0 %v1662_v12  ;;  %1263 = vmatprep.subr.bf16.mxu1 %v1584_v0 }
 0x14a   :  { %461 = vmatpush1.bf16.msra.mxu0 %v1670_v14  ;;  %1264 = vmatpush3.bf16.msra.mxu1 %v1686_v19 }
 0x14b   :  { %462 = vmatprep.subr.bf16.mxu0 %v1672_v15  ;;  %1265 = vmatprep.subr.bf16.mxu1 %v1584_v0 }
 0x14e   :  { %463 = vmatpush1.bf16.msra.mxu0 %v1680_v17  ;;  %1266 = vmatpush3.bf16.msra.mxu1 %v1696_v22 }
 0x14f   :  { %464 = vmatprep.subr.bf16.mxu0 %v1683_v18  ;;  %1267 = vmatprep.subr.bf16.mxu1 %v1584_v0 }
 0x152   :  { %465 = vmatpush1.bf16.msra.mxu0 %v1690_v20  ;;  %1268 = vmatpush3.bf16.msra.mxu1 %v1706_v25 }
 0x153   :  { %466 = vmatprep.subr.bf16.mxu0 %v1693_v21  ;;  %1269 = vmatprep.subr.bf16.mxu1 %v1584_v0 }
 0x156   :  { %467 = vmatpush1.bf16.msra.mxu0 %v1700_v23  ;;  %1270 = vmatpush3.bf16.msra.mxu1 %v1713_v27 }
 0x157   :  { %558 = vmatprep.subr.bf16.mxu0 %v1634_v2  ;;  %1275 = vmatprep.subr.bf16.mxu1 %v1584_v0 }
 0x1f9   :  { %v380_v62 = vpop.f32.mrf.mxu0  ;;  %v431_v63 = vpop.f32.mrf.mxu1 }
 0x1fa   :  { %v387_v24 = vadd.f32 %v380_v62, %v342_v61  ;;  %v432_v41 = vadd.f32 %v1757_v42, %v431_v63 }
 0x1fb   :  { %v382_v26 = vpop.f32.mrf.mxu0  ;;  %v1253_v28 = vpop.f32.mrf.mxu1 }
 0x1fc   :  { %v388_v29 = vmul.f32 0.5, %v387_v24  ;;  %v392_v35 = vadd.f32 %v382_v26, %v343_v34  ;;  %v449_v26 = vunpack.c.h.bf16 %v446_v53 }
 0x1fd   :  { %v384_v30 = vpop.f32.mrf.mxu0  ;;  %v434_v31 = vpop.f32.mrf.mxu1 }
 0x1fe   :  { %1425 = vtanh.f32 %v388_v29  ;;  %v393_v36 = vmul.f32 0.5, %v392_v35  ;;  %v1847_v31 = vld [vmem:[#allocation3 + $0x20] ss:$12 sps:$4 sm:$0xff]  }
 0x1ff   :  { %v385_v32 = vpop.f32.mrf.mxu0  ;;  %v1254_v33 = vpop.f32.mrf.mxu1 }
 0x200   :  { %1427 = vtanh.f32 %v393_v36  ;;  %v450_v33 = vunpack.c.l.bf16 %v1847_v31 }
 0x20b   :  { %v1426_v37 = vpop.eup %1425 }
 0x20c   :  { %v390_v38 = vmul.f32 0.5, %v1426_v37 }
 0x20d   :  { %v1428_v46 = vpop.eup %1427 }
 0x20e   :  { %v391_v40 = vadd.f32 0.5, %v390_v38  ;;  %v395_v47 = vmul.f32 0.5, %v1428_v46 }
 0x210   :  { %v437_v43 = vmul.f32 %v432_v41, %v391_v40  ;;  %v396_v49 = vadd.f32 0.5, %v395_v47 }
 0x212   :  { %v438_v44 = vadd.f32 %v437_v43, %v344_v39 }
 0x214   :  { %1429 = vtanh.f32 %v438_v44 }
 0x221   :  { %v1430_v48 = vpop.eup %1429 }
 0x222   :  { %v440_v50 = vsub.f32 %v1764_v58, %v1430_v48 }
 0x224   :  { %v441_v51 = vmul.f32 %v440_v50, %v396_v49 }
 0x226   :  { %v1807_v52 = vadd.f32 %v1430_v48, %v441_v51  ;;  %v552_v48 = vld [vmem:[#allocation3 + $0x24] sm:$0xff] }
 0x227   :  { %v554_v49 = vunpack.c.l.bf16 %v552_v48 }
 0x228   :  { %444 = vst [vmem:[#allocation9 + $0x8] sm:$0xff] %v1807_v52  ;;  %v451_v45 = vpack.c.bf16 %v1807_v52, %v1807_v52 }
 0x22a   :  { %485 = vmatmul.mubr.bf16.vlgmr.msra.gmra.mxu0 %v451_v45  ;;  %1272 = vmatmul.mubr.bf16.vlgmr.msra.gmra.mxu1 %v451_v45 }
 0x22b   :  { %559 = vmatpush1.bf16.msra.mxu0 %v1636_v3  ;;  %1276 = vmatpush3.bf16.msra.mxu1 %v1647_v7 }
 0x22c   :  { %560 = vmatprep.subr.bf16.mxu0 %v1639_v4  ;;  %1277 = vmatprep.subr.bf16.mxu1 %v1584_v0 }
 0x22d   :  { %590 = vmatprep.mubr.bf16.mxu0 %v1585_v1  ;;  %1291 = vmatprep.mubr.msk.bf16.mxu1 %vm1586_vm0, %v1584_v0 }
 0x22f   :  { %561 = vmatpush1.bf16.msra.mxu0 %v1642_v5  ;;  %1278 = vmatpush3.bf16.msra.mxu1 %v1656_v10 }
 0x230   :  { %562 = vmatprep.subr.bf16.mxu0 %v1645_v6  ;;  %1279 = vmatprep.subr.bf16.mxu1 %v1584_v0 }
 0x233   :  { %563 = vmatpush1.bf16.msra.mxu0 %v1650_v8  ;;  %1280 = vmatpush3.bf16.msra.mxu1 %v1666_v13 }
 0x234   :  { %564 = vmatprep.subr.bf16.mxu0 %v1652_v9  ;;  %1281 = vmatprep.subr.bf16.mxu1 %v1584_v0 }
 0x237   :  { %565 = vmatpush1.bf16.msra.mxu0 %v1659_v11  ;;  %1282 = vmatpush3.bf16.msra.mxu1 %v1676_v16 }
 0x238   :  { %566 = vmatprep.subr.bf16.mxu0 %v1662_v12  ;;  %1283 = vmatprep.subr.bf16.mxu1 %v1584_v0 }
 0x23b   :  { %567 = vmatpush1.bf16.msra.mxu0 %v1670_v14  ;;  %1284 = vmatpush3.bf16.msra.mxu1 %v1686_v19 }
 0x23c   :  { %568 = vmatprep.subr.bf16.mxu0 %v1672_v15  ;;  %1285 = vmatprep.subr.bf16.mxu1 %v1584_v0 }
 0x23f   :  { %569 = vmatpush1.bf16.msra.mxu0 %v1680_v17  ;;  %1286 = vmatpush3.bf16.msra.mxu1 %v1696_v22 }
 0x240   :  { %570 = vmatprep.subr.bf16.mxu0 %v1683_v18  ;;  %1287 = vmatprep.subr.bf16.mxu1 %v1584_v0 }
 0x243   :  { %571 = vmatpush1.bf16.msra.mxu0 %v1690_v20  ;;  %1288 = vmatpush3.bf16.msra.mxu1 %v1706_v25 }
 0x244   :  { %572 = vmatprep.subr.bf16.mxu0 %v1693_v21  ;;  %1289 = vmatprep.subr.bf16.mxu1 %v1584_v0 }
 0x247   :  { %573 = vmatpush1.bf16.msra.mxu0 %v1700_v23  ;;  %1290 = vmatpush3.bf16.msra.mxu1 %v1713_v27 }
 0x248   :  { %664 = vmatprep.subr.bf16.mxu0 %v1634_v2  ;;  %1295 = vmatprep.subr.bf16.mxu1 %v1584_v0 }
 0x2ea   :  { %v486_v55 = vpop.f32.mrf.mxu0  ;;  %v537_v56 = vpop.f32.mrf.mxu1 }
 0x2eb   :  { %v493_v57 = vadd.f32 %v486_v55, %v448_v54  ;;  %v538_v35 = vadd.f32 %v1757_v42, %v537_v56 }
 0x2ec   :  { %v488_v58 = vpop.f32.mrf.mxu0  ;;  %v1273_v59 = vpop.f32.mrf.mxu1 }
 0x2ed   :  { %v494_v60 = vmul.f32 0.5, %v493_v57  ;;  %v498_v28 = vadd.f32 %v488_v58, %v449_v26  ;;  %v555_v59 = vunpack.c.h.bf16 %v552_v48 }
 0x2ee   :  { %v490_v61 = vpop.f32.mrf.mxu0  ;;  %v540_v62 = vpop.f32.mrf.mxu1 }
 0x2ef   :  { %1431 = vtanh.f32 %v494_v60  ;;  %v499_v29 = vmul.f32 0.5, %v498_v28 }
 0x2f0   :  { %v491_v63 = vpop.f32.mrf.mxu0  ;;  %v1274_v24 = vpop.f32.mrf.mxu1 }
 0x2f1   :  { %1433 = vtanh.f32 %v499_v29  ;;  %v556_v24 = vunpack.c.h.bf16 %v1847_v31 }
 0x2fc   :  { %v1432_v30 = vpop.eup %1431 }
 0x2fd   :  { %v496_v32 = vmul.f32 0.5, %v1432_v30 }
 0x2fe   :  { %v1434_v38 = vpop.eup %1433 }
 0x2ff   :  { %v497_v34 = vadd.f32 0.5, %v496_v32  ;;  %v501_v39 = vmul.f32 0.5, %v1434_v38 }
 0x301   :  { %v543_v36 = vmul.f32 %v538_v35, %v497_v34  ;;  %v502_v41 = vadd.f32 0.5, %v501_v39  ;;  %v658_v39 = vld [vmem:[#allocation3 + $0x30] sm:$0xff] }
 0x303   :  { %v544_v37 = vadd.f32 %v543_v36, %v450_v33 }
 0x305   :  { %1435 = vtanh.f32 %v544_v37 }
 0x312   :  { %v1436_v40 = vpop.eup %1435 }
 0x313   :  { %v546_v43 = vsub.f32 %v1807_v52, %v1436_v40 }
 0x315   :  { %v547_v44 = vmul.f32 %v546_v43, %v502_v41 }
 0x317   :  { %v1852_v46 = vadd.f32 %v1436_v40, %v547_v44  ;;  %v660_v40 = vunpack.c.l.bf16 %v658_v39 }
 0x319   :  { %550 = vst [vmem:[#allocation9 + $0x10] sm:$0xff] %v1852_v46  ;;  %v557_v47 = vpack.c.bf16 %v1852_v46, %v1852_v46 }
 0x31b   :  { %591 = vmatmul.mubr.bf16.vlgmr.msra.gmra.mxu0 %v557_v47  ;;  %1292 = vmatmul.mubr.bf16.vlgmr.msra.gmra.mxu1 %v557_v47 }
 0x31c   :  { %665 = vmatpush1.bf16.msra.mxu0 %v1636_v3  ;;  %1296 = vmatpush3.bf16.msra.mxu1 %v1647_v7 }
 0x31d   :  { %666 = vmatprep.subr.bf16.mxu0 %v1639_v4  ;;  %1297 = vmatprep.subr.bf16.mxu1 %v1584_v0 }
 0x31e   :  { %696 = vmatprep.mubr.bf16.mxu0 %v1585_v1  ;;  %1311 = vmatprep.mubr.msk.bf16.mxu1 %vm1586_vm0, %v1584_v0 }
 0x320   :  { %667 = vmatpush1.bf16.msra.mxu0 %v1642_v5  ;;  %1298 = vmatpush3.bf16.msra.mxu1 %v1656_v10 }
 0x321   :  { %668 = vmatprep.subr.bf16.mxu0 %v1645_v6  ;;  %1299 = vmatprep.subr.bf16.mxu1 %v1584_v0 }
 0x324   :  { %669 = vmatpush1.bf16.msra.mxu0 %v1650_v8  ;;  %1300 = vmatpush3.bf16.msra.mxu1 %v1666_v13 }
 0x325   :  { %670 = vmatprep.subr.bf16.mxu0 %v1652_v9  ;;  %1301 = vmatprep.subr.bf16.mxu1 %v1584_v0 }
 0x328   :  { %671 = vmatpush1.bf16.msra.mxu0 %v1659_v11  ;;  %1302 = vmatpush3.bf16.msra.mxu1 %v1676_v16 }
 0x329   :  { %672 = vmatprep.subr.bf16.mxu0 %v1662_v12  ;;  %1303 = vmatprep.subr.bf16.mxu1 %v1584_v0 }
 0x32c   :  { %673 = vmatpush1.bf16.msra.mxu0 %v1670_v14  ;;  %1304 = vmatpush3.bf16.msra.mxu1 %v1686_v19 }
 0x32d   :  { %674 = vmatprep.subr.bf16.mxu0 %v1672_v15  ;;  %1305 = vmatprep.subr.bf16.mxu1 %v1584_v0 }
 0x330   :  { %675 = vmatpush1.bf16.msra.mxu0 %v1680_v17  ;;  %1306 = vmatpush3.bf16.msra.mxu1 %v1696_v22 }
 0x331   :  { %676 = vmatprep.subr.bf16.mxu0 %v1683_v18  ;;  %1307 = vmatprep.subr.bf16.mxu1 %v1584_v0 }
 0x334   :  { %677 = vmatpush1.bf16.msra.mxu0 %v1690_v20  ;;  %1308 = vmatpush3.bf16.msra.mxu1 %v1706_v25 }
 0x335   :  { %678 = vmatprep.subr.bf16.mxu0 %v1693_v21  ;;  %1309 = vmatprep.subr.bf16.mxu1 %v1584_v0 }
 0x338   :  { %679 = vmatpush1.bf16.msra.mxu0 %v1700_v23  ;;  %1310 = vmatpush3.bf16.msra.mxu1 %v1713_v27 }
 0x339   :  { %770 = vmatprep.subr.bf16.mxu0 %v1634_v2  ;;  %1315 = vmatprep.subr.bf16.mxu1 %v1584_v0 }
 0x3db   :  { %v592_v50 = vpop.f32.mrf.mxu0  ;;  %v643_v51 = vpop.f32.mrf.mxu1 }
 0x3dc   :  { %v599_v52 = vadd.f32 %v592_v50, %v554_v49  ;;  %v644_v28 = vadd.f32 %v1757_v42, %v643_v51 }
 0x3dd   :  { %v594_v45 = vpop.f32.mrf.mxu0  ;;  %v1293_v53 = vpop.f32.mrf.mxu1 }
 0x3de   :  { %v600_v54 = vmul.f32 0.5, %v599_v52  ;;  %v604_v60 = vadd.f32 %v594_v45, %v555_v59  ;;  %v661_v45 = vunpack.c.h.bf16 %v658_v39 }
 0x3df   :  { %v596_v55 = vpop.f32.mrf.mxu0  ;;  %v646_v56 = vpop.f32.mrf.mxu1 }
 0x3e0   :  { %1437 = vtanh.f32 %v600_v54  ;;  %v605_v61 = vmul.f32 0.5, %v604_v60  ;;  %v1935_v56 = vld [vmem:[#allocation3 + $0x38] ss:$12 sps:$4 sm:$0xff]  }
 0x3e1   :  { %v597_v57 = vpop.f32.mrf.mxu0  ;;  %v1294_v58 = vpop.f32.mrf.mxu1 }
 0x3e2   :  { %1439 = vtanh.f32 %v605_v61  ;;  %v662_v58 = vunpack.c.l.bf16 %v1935_v56 }
 0x3ed   :  { %v1438_v62 = vpop.eup %1437 }
 0x3ee   :  { %v602_v63 = vmul.f32 0.5, %v1438_v62 }
 0x3ef   :  { %v1440_v32 = vpop.eup %1439 }
 0x3f0   :  { %v603_v26 = vadd.f32 0.5, %v602_v63  ;;  %v607_v33 = vmul.f32 0.5, %v1440_v32 }
 0x3f2   :  { %v649_v29 = vmul.f32 %v644_v28, %v603_v26  ;;  %v608_v35 = vadd.f32 0.5, %v607_v33 }
 0x3f4   :  { %v650_v30 = vadd.f32 %v649_v29, %v556_v24 }
 0x3f6   :  { %1441 = vtanh.f32 %v650_v30 }
 0x403   :  { %v1442_v34 = vpop.eup %1441 }
 0x404   :  { %v652_v36 = vsub.f32 %v1852_v46, %v1442_v34 }
 0x406   :  { %v653_v37 = vmul.f32 %v652_v36, %v608_v35 }
 0x408   :  { %v1895_v38 = vadd.f32 %v1442_v34, %v653_v37 }
 0x40a   :  { %656 = vst [vmem:[#allocation9 + $0x18] sm:$0xff] %v1895_v38  ;;  %v663_v31 = vpack.c.bf16 %v1895_v38, %v1895_v38 }
 0x40c   :  { %697 = vmatmul.mubr.bf16.vlgmr.msra.gmra.mxu0 %v663_v31  ;;  %1312 = vmatmul.mubr.bf16.vlgmr.msra.gmra.mxu1 %v663_v31 }
 0x40d   :  { %771 = vmatpush1.bf16.msra.mxu0 %v1636_v3  ;;  %1316 = vmatpush3.bf16.msra.mxu1 %v1647_v7 }
 0x40e   :  { %772 = vmatprep.subr.bf16.mxu0 %v1639_v4  ;;  %1317 = vmatprep.subr.bf16.mxu1 %v1584_v0 }
 0x40f   :  { %802 = vmatprep.mubr.bf16.mxu0 %v1585_v1  ;;  %1331 = vmatprep.mubr.msk.bf16.mxu1 %vm1586_vm0, %v1584_v0 }
 0x411   :  { %773 = vmatpush1.bf16.msra.mxu0 %v1642_v5  ;;  %1318 = vmatpush3.bf16.msra.mxu1 %v1656_v10 }
 0x412   :  { %774 = vmatprep.subr.bf16.mxu0 %v1645_v6  ;;  %1319 = vmatprep.subr.bf16.mxu1 %v1584_v0 }
 0x415   :  { %775 = vmatpush1.bf16.msra.mxu0 %v1650_v8  ;;  %1320 = vmatpush3.bf16.msra.mxu1 %v1666_v13 }
 0x416   :  { %776 = vmatprep.subr.bf16.mxu0 %v1652_v9  ;;  %1321 = vmatprep.subr.bf16.mxu1 %v1584_v0 }
 0x419   :  { %777 = vmatpush1.bf16.msra.mxu0 %v1659_v11  ;;  %1322 = vmatpush3.bf16.msra.mxu1 %v1676_v16 }
 0x41a   :  { %778 = vmatprep.subr.bf16.mxu0 %v1662_v12  ;;  %1323 = vmatprep.subr.bf16.mxu1 %v1584_v0 }
 0x41d   :  { %779 = vmatpush1.bf16.msra.mxu0 %v1670_v14  ;;  %1324 = vmatpush3.bf16.msra.mxu1 %v1686_v19 }
 0x41e   :  { %780 = vmatprep.subr.bf16.mxu0 %v1672_v15  ;;  %1325 = vmatprep.subr.bf16.mxu1 %v1584_v0 }
 0x421   :  { %781 = vmatpush1.bf16.msra.mxu0 %v1680_v17  ;;  %1326 = vmatpush3.bf16.msra.mxu1 %v1696_v22 }
 0x422   :  { %782 = vmatprep.subr.bf16.mxu0 %v1683_v18  ;;  %1327 = vmatprep.subr.bf16.mxu1 %v1584_v0 }
 0x425   :  { %783 = vmatpush1.bf16.msra.mxu0 %v1690_v20  ;;  %1328 = vmatpush3.bf16.msra.mxu1 %v1706_v25 }
 0x426   :  { %784 = vmatprep.subr.bf16.mxu0 %v1693_v21  ;;  %1329 = vmatprep.subr.bf16.mxu1 %v1584_v0 }
 0x429   :  { %785 = vmatpush1.bf16.msra.mxu0 %v1700_v23  ;;  %1330 = vmatpush3.bf16.msra.mxu1 %v1713_v27 }
 0x42a   :  { %876 = vmatprep.subr.bf16.mxu0 %v1634_v2  ;;  %1335 = vmatprep.subr.bf16.mxu1 %v1584_v0 }
 0x4cc   :  { %v698_v41 = vpop.f32.mrf.mxu0  ;;  %v749_v43 = vpop.f32.mrf.mxu1 }
 0x4cd   :  { %v705_v44 = vadd.f32 %v698_v41, %v660_v40  ;;  %v750_v60 = vadd.f32 %v1757_v42, %v749_v43 }
 0x4ce   :  { %v700_v46 = vpop.f32.mrf.mxu0  ;;  %v1313_v47 = vpop.f32.mrf.mxu1 }
 0x4cf   :  { %v706_v48 = vmul.f32 0.5, %v705_v44  ;;  %v710_v53 = vadd.f32 %v700_v46, %v661_v45  ;;  %v768_v47 = vunpack.c.h.bf16 %v1935_v56 }
 0x4d0   :  { %v702_v49 = vpop.f32.mrf.mxu0  ;;  %v752_v50 = vpop.f32.mrf.mxu1 }
 0x4d1   :  { %1443 = vtanh.f32 %v706_v48  ;;  %v711_v54 = vmul.f32 0.5, %v710_v53 }
 0x4d2   :  { %v703_v51 = vpop.f32.mrf.mxu0  ;;  %v1314_v52 = vpop.f32.mrf.mxu1 }
 0x4d3   :  { %1445 = vtanh.f32 %v711_v54 }
 0x4de   :  { %v1444_v55 = vpop.eup %1443 }
 0x4df   :  { %v708_v57 = vmul.f32 0.5, %v1444_v55 }
 0x4e0   :  { %v1446_v63 = vpop.eup %1445 }
 0x4e1   :  { %v709_v59 = vadd.f32 0.5, %v708_v57  ;;  %v713_v24 = vmul.f32 0.5, %v1446_v63 }
 0x4e3   :  { %v755_v61 = vmul.f32 %v750_v60, %v709_v59  ;;  %v714_v28 = vadd.f32 0.5, %v713_v24  ;;  %v1467_v59 = vld [vmem:[#allocation6 + $0xa8] ss:$12 sps:$4 sm:$0xff]  }
 0x4e4   :  { %v1468_v60 = vld [vmem:[#allocation6 + $0x94] ss:$12 sps:$4 sm:$0xff]  }
 0x4e5   :  { %v756_v62 = vadd.f32 %v755_v61, %v662_v58  ;;  %v1469_v61 = vld [vmem:[#allocation6 + $0x90] ss:$12 sps:$4 sm:$0xff]  }
 0x4e7   :  { %1447 = vtanh.f32 %v756_v62  ;;  %v1470_v62 = vld [vmem:[#allocation6 + $0x7c] ss:$12 sps:$4 sm:$0xff]  }
 0x4f4   :  { %v1448_v26 = vpop.eup %1447 }
 0x4f5   :  { %v758_v29 = vsub.f32 %v1895_v38, %v1448_v26 }
 0x4f7   :  { %v759_v30 = vmul.f32 %v758_v29, %v714_v28 }
 0x4f9   :  { %v1940_v32 = vadd.f32 %v1448_v26, %v759_v30 }
 0x4fb   :  { %762 = vst [vmem:[#allocation9 + $0x20] sm:$0xff] %v1940_v32  ;;  %v769_v33 = vpack.c.bf16 %v1940_v32, %v1940_v32 }
 0x4fd   :  { %803 = vmatmul.mubr.bf16.vlgmr.msra.gmra.mxu0 %v769_v33  ;;  %1332 = vmatmul.mubr.bf16.vlgmr.msra.gmra.mxu1 %v769_v33 }
 0x4fe   :  { %877 = vmatpush1.bf16.msra.mxu0 %v1636_v3  ;;  %1336 = vmatpush3.bf16.msra.mxu1 %v1647_v7  ;;  %v764_v3 = vld [vmem:[#allocation3 + $0x3c] sm:$0xff] }
 0x4ff   :  { %878 = vmatprep.subr.bf16.mxu0 %v1639_v4  ;;  %1337 = vmatprep.subr.bf16.mxu1 %v1584_v0  ;;  %v766_v4 = vunpack.c.l.bf16 %v764_v3  ;;  %v767_v41 = vunpack.c.h.bf16 %v764_v3 }
 0x500   :  { %908 = vmatprep.mubr.bf16.mxu0 %v1585_v1  ;;  %1351 = vmatprep.mubr.msk.bf16.mxu1 %vm1586_vm0, %v1584_v0 }
 0x502   :  { %879 = vmatpush1.bf16.msra.mxu0 %v1642_v5  ;;  %1338 = vmatpush3.bf16.msra.mxu1 %v1656_v10 }
 0x503   :  { %880 = vmatprep.subr.bf16.mxu0 %v1645_v6  ;;  %1339 = vmatprep.subr.bf16.mxu1 %v1584_v0 }
 0x506   :  { %881 = vmatpush1.bf16.msra.mxu0 %v1650_v8  ;;  %1340 = vmatpush3.bf16.msra.mxu1 %v1666_v13 }
 0x507   :  { %882 = vmatprep.subr.bf16.mxu0 %v1652_v9  ;;  %1341 = vmatprep.subr.bf16.mxu1 %v1584_v0 }
 0x50a   :  { %883 = vmatpush1.bf16.msra.mxu0 %v1659_v11  ;;  %1342 = vmatpush3.bf16.msra.mxu1 %v1676_v16 }
 0x50b   :  { %884 = vmatprep.subr.bf16.mxu0 %v1662_v12  ;;  %1343 = vmatprep.subr.bf16.mxu1 %v1584_v0 }
 0x50e   :  { %885 = vmatpush1.bf16.msra.mxu0 %v1670_v14  ;;  %1344 = vmatpush3.bf16.msra.mxu1 %v1686_v19 }
 0x50f   :  { %886 = vmatprep.subr.bf16.mxu0 %v1672_v15  ;;  %1345 = vmatprep.subr.bf16.mxu1 %v1584_v0 }
 0x512   :  { %887 = vmatpush1.bf16.msra.mxu0 %v1680_v17  ;;  %1346 = vmatpush3.bf16.msra.mxu1 %v1696_v22 }
 0x513   :  { %888 = vmatprep.subr.bf16.mxu0 %v1683_v18  ;;  %1347 = vmatprep.subr.bf16.mxu1 %v1584_v0 }
 0x516   :  { %889 = vmatpush1.bf16.msra.mxu0 %v1690_v20  ;;  %1348 = vmatpush3.bf16.msra.mxu1 %v1706_v25 }
 0x517   :  { %890 = vmatprep.subr.bf16.mxu0 %v1693_v21  ;;  %1349 = vmatprep.subr.bf16.mxu1 %v1584_v0 }
 0x51a   :  { %891 = vmatpush1.bf16.msra.mxu0 %v1700_v23  ;;  %1350 = vmatpush3.bf16.msra.mxu1 %v1713_v27 }
 0x51b   :  { %982 = vmatprep.subr.bf16.mxu0 %v1634_v2  ;;  %1355 = vmatprep.subr.bf16.mxu1 %v1584_v0 }
 0x5bd   :  { %v804_v5 = vpop.f32.mrf.mxu0  ;;  %v855_v6 = vpop.f32.mrf.mxu1 }
 0x5be   :  { %v811_v34 = vadd.f32 %v804_v5, %v766_v4  ;;  %v856_v49 = vadd.f32 %v1757_v42, %v855_v6  ;;  %v976_v5 = vld [vmem:[#allocation3 + $0x54] sm:$0xff] }
 0x5bf   :  { %v806_v35 = vpop.f32.mrf.mxu0  ;;  %v1333_v36 = vpop.f32.mrf.mxu1  ;;  %v978_v6 = vunpack.c.l.bf16 %v976_v5 }
 0x5c0   :  { %v812_v37 = vmul.f32 0.5, %v811_v34  ;;  %v816_v43 = vadd.f32 %v806_v35, %v767_v41 }
 0x5c1   :  { %v808_v38 = vpop.f32.mrf.mxu0  ;;  %v858_v31 = vpop.f32.mrf.mxu1 }
 0x5c2   :  { %1449 = vtanh.f32 %v812_v37  ;;  %v817_v44 = vmul.f32 0.5, %v816_v43 }
 0x5c3   :  { %v809_v39 = vpop.f32.mrf.mxu0  ;;  %v1334_v40 = vpop.f32.mrf.mxu1 }
 0x5c4   :  { %1451 = vtanh.f32 %v817_v44  ;;  %v979_v44 = vunpack.c.h.bf16 %v976_v5 }
 0x5cf   :  { %v1450_v46 = vpop.eup %1449 }
 0x5d0   :  { %v814_v2 = vmul.f32 0.5, %v1450_v46 }
 0x5d1   :  { %v1452_v52 = vpop.eup %1451 }
 0x5d2   :  { %v815_v48 = vadd.f32 0.5, %v814_v2  ;;  %v819_v45 = vmul.f32 0.5, %v1452_v52 }
 0x5d4   :  { %v861_v50 = vmul.f32 %v856_v49, %v815_v48  ;;  %v820_v54 = vadd.f32 0.5, %v819_v45 }
 0x5d6   :  { %v862_v51 = vadd.f32 %v861_v50, %v768_v47 }
 0x5d8   :  { %1453 = vtanh.f32 %v862_v51 }
 0x5e5   :  { %v1454_v53 = vpop.eup %1453 }
 0x5e6   :  { %v864_v55 = vsub.f32 %v1940_v32, %v1454_v53 }
 0x5e8   :  { %v865_v57 = vmul.f32 %v864_v55, %v820_v54 }
 0x5ea   :  { %v1983_v58 = vadd.f32 %v1454_v53, %v865_v57 }
 0x5ec   :  { %868 = vst [vmem:[#allocation9 + $0x28] sm:$0xff] %v1983_v58  ;;  %v875_v56 = vpack.c.bf16 %v1983_v58, %v1983_v58 }
 0x5ee   :  { %909 = vmatmul.mubr.bf16.vlgmr.msra.gmra.mxu0 %v875_v56  ;;  %1352 = vmatmul.mubr.bf16.vlgmr.msra.gmra.mxu1 %v875_v56 }
 0x5ef   :  { %983 = vmatpush1.bf16.msra.mxu0 %v1467_v59  ;;  %1356 = vmatpush3.bf16.msra.mxu1 %v1647_v7 }
 0x5f0   :  { %984 = vmatprep.subr.bf16.mxu0 %v1468_v60  ;;  %1357 = vmatprep.subr.bf16.mxu1 %v1584_v0 }
 0x5f1   :  { %1014 = vmatprep.mubr.bf16.mxu0 %v1585_v1  ;;  %1371 = vmatprep.mubr.msk.bf16.mxu1 %vm1586_vm0, %v1584_v0  ;;  %v870_v1 = vld [vmem:[#allocation3 + $0x48] sm:$0xff] }
 0x5f2   :  { %v872_v7 = vunpack.c.l.bf16 %v870_v1 }
 0x5f3   :  { %985 = vmatpush1.bf16.msra.mxu0 %v1469_v61  ;;  %1358 = vmatpush3.bf16.msra.mxu1 %v1656_v10 }
 0x5f4   :  { %986 = vmatprep.subr.bf16.mxu0 %v1470_v62  ;;  %1359 = vmatprep.subr.bf16.mxu1 %v1584_v0 }
 0x5f7   :  { %987 = vmatpush1.bf16.msra.mxu0 %v1650_v8  ;;  %1360 = vmatpush3.bf16.msra.mxu1 %v1666_v13 }
 0x5f8   :  { %988 = vmatprep.subr.bf16.mxu0 %v1652_v9  ;;  %1361 = vmatprep.subr.bf16.mxu1 %v1584_v0 }
 0x5fb   :  { %989 = vmatpush1.bf16.msra.mxu0 %v1659_v11  ;;  %1362 = vmatpush3.bf16.msra.mxu1 %v1676_v16 }
 0x5fc   :  { %990 = vmatprep.subr.bf16.mxu0 %v1662_v12  ;;  %1363 = vmatprep.subr.bf16.mxu1 %v1584_v0 }
 0x5ff   :  { %991 = vmatpush1.bf16.msra.mxu0 %v1670_v14  ;;  %1364 = vmatpush3.bf16.msra.mxu1 %v1686_v19 }
 0x600   :  { %992 = vmatprep.subr.bf16.mxu0 %v1672_v15  ;;  %1365 = vmatprep.subr.bf16.mxu1 %v1584_v0 }
 0x603   :  { %993 = vmatpush1.bf16.msra.mxu0 %v1680_v17  ;;  %1366 = vmatpush3.bf16.msra.mxu1 %v1696_v22 }
 0x604   :  { %994 = vmatprep.subr.bf16.mxu0 %v1683_v18  ;;  %1367 = vmatprep.subr.bf16.mxu1 %v1584_v0  ;;  %v873_v18 = vunpack.c.h.bf16 %v870_v1 }
 0x607   :  { %995 = vmatpush1.bf16.msra.mxu0 %v1690_v20  ;;  %1368 = vmatpush3.bf16.msra.mxu1 %v1706_v25 }
 0x608   :  { %996 = vmatprep.subr.bf16.mxu0 %v1693_v21  ;;  %1369 = vmatprep.subr.bf16.mxu1 %v1584_v0  ;;  %v871_v21 = vld [vmem:[#allocation3 + $0x50] ss:$12 sps:$4 sm:$0xff]  }
 0x609   :  { %v980_v49 = vunpack.c.h.bf16 %v871_v21 }
 0x60b   :  { %997 = vmatpush1.bf16.msra.mxu0 %v1700_v23  ;;  %1370 = vmatpush3.bf16.msra.mxu1 %v1713_v27  ;;  %v874_v23 = vunpack.c.l.bf16 %v871_v21 }
 0x6ae   :  { %v910_v8 = vpop.f32.mrf.mxu0  ;;  %v961_v9 = vpop.f32.mrf.mxu1 }
 0x6af   :  { %v917_v10 = vadd.f32 %v910_v8, %v872_v7  ;;  %v962_v27 = vadd.f32 %v1757_v42, %v961_v9 }
 0x6b0   :  { %v912_v11 = vpop.f32.mrf.mxu0  ;;  %v1353_v12 = vpop.f32.mrf.mxu1 }
 0x6b1   :  { %v918_v13 = vmul.f32 0.5, %v917_v10  ;;  %v922_v19 = vadd.f32 %v912_v11, %v873_v18 }
 0x6b2   :  { %v914_v14 = vpop.f32.mrf.mxu0  ;;  %v964_v15 = vpop.f32.mrf.mxu1 }
 0x6b3   :  { %1455 = vtanh.f32 %v918_v13  ;;  %v923_v0 = vmul.f32 0.5, %v922_v19 }
 0x6b4   :  { %v915_v16 = vpop.f32.mrf.mxu0  ;;  %v1354_v17 = vpop.f32.mrf.mxu1 }
 0x6b5   :  { %1457 = vtanh.f32 %v923_v0 }
 0x6c0   :  { %v1456_v20 = vpop.eup %1455 }
 0x6c1   :  { %v920_v22 = vmul.f32 0.5, %v1456_v20 }
 0x6c2   :  { %v1458_v26 = vpop.eup %1457 }
 0x6c3   :  { %v921_v25 = vadd.f32 0.5, %v920_v22  ;;  %v925_v28 = vmul.f32 0.5, %v1458_v26 }
 0x6c5   :  { %v967_v63 = vmul.f32 %v962_v27, %v921_v25  ;;  %v926_v30 = vadd.f32 0.5, %v925_v28 }
 0x6c7   :  { %v968_v24 = vadd.f32 %v967_v63, %v874_v23 }
 0x6c9   :  { %1459 = vtanh.f32 %v968_v24 }
 0x6d6   :  { %v1460_v29 = vpop.eup %1459 }
 0x6d7   :  { %v970_v32 = vsub.f32 %v1983_v58, %v1460_v29 }
 0x6d9   :  { %v971_v33 = vmul.f32 %v970_v32, %v926_v30 }
 0x6db   :  { %v972_v3 = vadd.f32 %v1460_v29, %v971_v33 }
 0x6dd   :  { %974 = vst [vmem:[#allocation9 + $0x30] sm:$0xff] %v972_v3  ;;  %v981_v4 = vpack.c.bf16 %v972_v3, %v972_v3 }
 0x6df   :  { %1015 = vmatmul.mubr.bf16.vlgmr.msra.gmra.mxu0 %v981_v4  ;;  %1372 = vmatmul.mubr.bf16.vlgmr.msra.gmra.mxu1 %v981_v4 }
 0x79f   :  { %v1016_v34 = vpop.f32.mrf.mxu0  ;;  %v1067_v35 = vpop.f32.mrf.mxu1 }
 0x7a0   :  { %v1023_v36 = vadd.f32 %v1016_v34, %v978_v6  ;;  %v1068_v51 = vadd.f32 %v1757_v42, %v1067_v35 }
 0x7a1   :  { %v1018_v37 = vpop.f32.mrf.mxu0  ;;  %v1373_v38 = vpop.f32.mrf.mxu1 }
 0x7a2   :  { %v1024_v31 = vmul.f32 0.5, %v1023_v36  ;;  %v1028_v46 = vadd.f32 %v1018_v37, %v979_v44 }
 0x7a3   :  { %v1020_v39 = vpop.f32.mrf.mxu0  ;;  %v1070_v40 = vpop.f32.mrf.mxu1 }
 0x7a4   :  { %1461 = vtanh.f32 %v1024_v31  ;;  %v1029_v2 = vmul.f32 0.5, %v1028_v46 }
 0x7a5   :  { %v1021_v41 = vpop.f32.mrf.mxu0  ;;  %v1374_v43 = vpop.f32.mrf.mxu1 }
 0x7a6   :  { %1463 = vtanh.f32 %v1029_v2 }
 0x7b1   :  { %v1462_v47 = vpop.eup %1461 }
 0x7b2   :  { %v1026_v48 = vmul.f32 0.5, %v1462_v47 }
 0x7b3   :  { %v1464_v53 = vpop.eup %1463 }
 0x7b4   :  { %v1027_v50 = vadd.f32 0.5, %v1026_v48  ;;  %v1031_v54 = vmul.f32 0.5, %v1464_v53 }
 0x7b6   :  { %v1073_v52 = vmul.f32 %v1068_v51, %v1027_v50  ;;  %v1032_v57 = vadd.f32 0.5, %v1031_v54 }
 0x7b8   :  { %v1074_v45 = vadd.f32 %v1073_v52, %v980_v49 }
 0x7ba   :  { %1465 = vtanh.f32 %v1074_v45 }
 0x7c7   :  { %v1466_v55 = vpop.eup %1465 }
 0x7c8   :  { %v1076_v58 = vsub.f32 %v972_v3, %v1466_v55 }
 0x7ca   :  { %v1077_v56 = vmul.f32 %v1076_v58, %v1032_v57 }
 0x7cc   :  { %v1078_v59 = vadd.f32 %v1466_v55, %v1077_v56 }
 0x7ce   :  { %1080 = vst [vmem:[#allocation9 + $0x38] sm:$0xff] %v1078_v59  ;;  %1085 = vst [vmem:[#allocation10] sm:$0xff] %v1078_v59 }
 0x7cf   :  { %1542 = shalt.err (!%p1539_p5)
}
 0x7d0   :  { %s1589_s13 = smov 128   ;;  %s1590_s14 = smov 8  }
 0x7d1   :  { %1097 = dma.vmem_to_hbm [thread:$0]  %s1092_s9, 1024, %s2030_s4, [#allocation5], %s1589_s13, %s1589_s13, %s1590_s14  }
 0x7d2   :  { %s1551_s17 = scalar_lea.vmem %s1105_s11, 128  ;;  %p1556_p7 = scmp.lt.s32.totalorder %s1105_s11, %s1105_s11 }
 0x7d3   :  { %p1552_p6 = scmp.ne.s32.totalorder %s1105_s11, %s1551_s17  ;;  %p1557_p8 = scmp.lt.s32.totalorder %s1551_s17, %s1551_s17 }
 0x7d5   :  { %p1558_p9 = por %p1557_p8, %p1556_p7 }
 0x7d7   :  { %p1559_p10 = pnand %p1558_p9, %p1552_p6 }
 0x7d9   :  { %1562 = shalt.err (!%p1559_p10)
}
 0x7da   :  { %1107 = dma.vmem_to_hbm [thread:$0]  %s1105_s11, 128, %s2031_s5, [#allocation11]  }
 0x7db   :  { %1575 = dma.done.wait [#allocation5], 1024  }
 0x7dc   :  { %1576 = vsyncadd [#allocation5], 4294966272 }
 0x7dd   :  { %1577 = dma.done.wait [#allocation11], 128  }
 0x7de   :  { %1578 = vsyncadd [#allocation11], 4294967168 }
 0x7df   :  { %1114 = vsyncpa [#allocation4], 1 }
 0x7e0   :  { %1115 = vsyncpa [#allocation7], 1 }
 0x7e1   :  { %1116 = vsyncpa [#allocation5], 1 }
 0x7e2   :  { %1117 = vsyncpa [#allocation11], 1 }

</bundles_post_ra>
